<compile_context>
chip_gen: v5e
topology: v5e:2x2
jax: 0.10.0
libtpu: 0.0.40
codegen_flags: <defaults>
</compile_context>

<pallas_src>
import functools

import jax
import jax.numpy as jnp
from jax.experimental import pallas as pl
from jax.experimental.pallas import tpu as pltpu


LANE = 128  # TPU lane width


def _round_up(n, m):
    return ((n + m - 1) // m) * m


def _fused_mlp_kernel(*refs, n_layers):
    """refs = (x_ref, w1_ref, b1_ref, ..., wL_ref, bL_ref, o_ref).

    All refs are full-array VMEM tiles.  Hidden activations stay in
    vregs/VMEM; only the final (lane-dense, padded) logits are written out.
    """
    x_ref = refs[0]
    o_ref = refs[-1]
    wb_refs = refs[1:-1]

    h = x_ref[...]  # bf16 (M, K0)
    for i in range(n_layers):
        w_ref = wb_refs[2 * i]      # bf16 (K_i, N_i)
        b_ref = wb_refs[2 * i + 1]  # f32  (1, N_i)
        # MXU matmul with f32 accumulation; bias add + ReLU on the VPU in f32.
        y = jnp.dot(h, w_ref[...], preferred_element_type=jnp.float32)
        y = y + b_ref[...]  # (1, N) broadcasts over rows
        if i < n_layers - 1:
            y = jnp.maximum(y, 0.0)
            h = y.astype(jnp.bfloat16)  # bf16 feed for the next MXU matmul
        else:
            o_ref[...] = y.astype(o_ref.dtype)  # logits stay f32


def fused_mlp_pallas(x2d, params):
    """Run the whole MLP in a single Pallas kernel.

    x2d:    (M, input_size) bfloat16
    params: list of (w, b) with w: (in, out) bfloat16, b: (out,) float32.
            The last layer is already zero-padded to a multiple of 128 lanes.
    Returns (M, padded_n_out) float32 logits (caller slices real classes).
    """
    M = x2d.shape[0]
    n_layers = len(params)
    n_out_padded = params[-1][0].shape[1]

    args = [x2d]
    for w, b in params:
        args.append(w)
        args.append(b.reshape(1, -1))

    kernel = functools.partial(_fused_mlp_kernel, n_layers=n_layers)
    vmem = pl.BlockSpec(memory_space=pltpu.MemorySpace.VMEM)

    return pl.pallas_call(
        kernel,
        out_shape=jax.ShapeDtypeStruct((M, n_out_padded), jnp.float32),
        in_specs=[vmem] * len(args),
        out_specs=vmem,
    )(*args)


def init_mlp_params(key, input_size, hidden_sizes, n_classes):
    """Deterministic init mimicking torch.nn.Linear (U(-1/sqrt(fan_in), +)).

    Weights stored as (in, out) bfloat16; biases float32.  The output layer is
    zero-padded to a multiple of 128 lanes for lane-dense stores.
    """
    sizes = [input_size] + list(hidden_sizes) + [n_classes]
    params = []
    n_layers = len(sizes) - 1
    for li, (in_size, out_size) in enumerate(zip(sizes[:-1], sizes[1:])):
        key, kw, kb = jax.random.split(key, 3)
        bound = 1.0 / jnp.sqrt(jnp.float32(in_size))
        w = jax.random.uniform(kw, (in_size, out_size), jnp.float32,
                               minval=-bound, maxval=bound)
        b = jax.random.uniform(kb, (out_size,), jnp.float32,
                               minval=-bound, maxval=bound)
        if li == n_layers - 1:
            # Pad the output layer to a lane-dense width; padded logits are 0
            # and get sliced off after the kernel.
            n_pad = _round_up(out_size, LANE)
            w = jnp.pad(w, ((0, 0), (0, n_pad - out_size)))
            b = jnp.pad(b, (0, n_pad - out_size))
        params.append((w.astype(jnp.bfloat16), b.astype(jnp.float32)))
    return params


def mlp_forward(x, params, input_size, n_classes):
    # Glue: flatten exactly like x.view(-1, input_size) in the PyTorch module.
    # Activations fed to the MXU as bf16 (f32 accumulate inside the kernel).
    x2d = x.reshape(-1, input_size).astype(jnp.bfloat16)
    # TODO(synk): if the surrounding workload allows, batch >=128 rows per call
    # (and shard an M grid axis across v7x's two TensorCores) to amortize the
    # weight DMA; with batch=8 this kernel is weight-bandwidth bound.
    out_padded = fused_mlp_pallas(x2d, params)
    return out_padded[:, :n_classes]


if __name__ == "__main__":
    input_size = 784
    hidden_sizes = [512, 256]
    n_classes = 10
    batch = 8

    key = jax.random.PRNGKey(0)
    key, kx = jax.random.split(key)
    # MNIST-style images (batch, 1, 28, 28) -> flattened to (batch, 784)
    x = jax.random.normal(kx, (batch, 1, 28, 28), jnp.float32)

    params = init_mlp_params(key, input_size, hidden_sizes, n_classes)

    logits = mlp_forward(x, params, input_size, n_classes)
    logits = jax.block_until_ready(logits)

    # Correctness check against a pure-JAX reference using the SAME bf16
    # weights / bf16 activation casts (f32 math), so the only differences are
    # f32 accumulation-order rounding inside the MXU.
    ref = x.reshape(-1, input_size).astype(jnp.bfloat16).astype(jnp.float32)
    for w, b in params[:-1]:
        z = ref @ w.astype(jnp.float32) + b
        ref = jnp.maximum(z, 0.0).astype(jnp.bfloat16).astype(jnp.float32)
    w_out, b_out = params[-1]
    ref_logits = (ref @ w_out.astype(jnp.float32) + b_out)[:, :n_classes]

    assert logits.shape == (batch, n_classes)
    assert jnp.allclose(logits, ref_logits, atol=5e-3, rtol=5e-3)

    print("KERNEL_OK")
</pallas_src>

<mosaic_0001>
module attributes {stable_mosaic.version = 11 : i64} {
  func.func @_fused_mlp_kernel(%arg0: memref<8x784xbf16, #tpu.memory_space<vmem>>, %arg1: memref<784x512xbf16, #tpu.memory_space<vmem>>, %arg2: memref<1x512xf32, #tpu.memory_space<vmem>>, %arg3: memref<512x256xbf16, #tpu.memory_space<vmem>>, %arg4: memref<1x256xf32, #tpu.memory_space<vmem>>, %arg5: memref<256x128xbf16, #tpu.memory_space<vmem>>, %arg6: memref<1x128xf32, #tpu.memory_space<vmem>>, %arg7: memref<8x128xf32, #tpu.memory_space<vmem>>) attributes {dimension_semantics = [], scalar_prefetch = 0 : i64, scratch_operands = 0 : i64, tpu.core_type = #tpu.core_type<tc>} {
    %c0 = arith.constant 0 : index
    %c0_0 = arith.constant 0 : index
    %0 = vector.load %arg0[%c0, %c0_0] : memref<8x784xbf16, #tpu.memory_space<vmem>>, vector<8x784xbf16>
    %c0_1 = arith.constant 0 : index
    %c0_2 = arith.constant 0 : index
    %1 = vector.load %arg1[%c0_1, %c0_2] : memref<784x512xbf16, #tpu.memory_space<vmem>>, vector<784x512xbf16>
    %cst = arith.constant dense<0.000000e+00> : vector<8x512xf32>
    %2 = tpu.matmul %0, %1, %cst {dimension_numbers = #tpu.dot_dimension_numbers<[1], [0], [0], [1], [0, 0, 1, 1], [], []>} : vector<8x784xbf16>, vector<784x512xbf16>, vector<8x512xf32> -> vector<8x512xf32>
    %c0_3 = arith.constant 0 : index
    %c0_4 = arith.constant 0 : index
    %3 = vector.load %arg2[%c0_3, %c0_4] : memref<1x512xf32, #tpu.memory_space<vmem>>, vector<1x512xf32>
    %4 = vector.broadcast %3 : vector<1x512xf32> to vector<8x512xf32>
    %5 = arith.addf %2, %4 : vector<8x512xf32>
    %cst_5 = arith.constant 0.000000e+00 : f32
    %6 = vector.broadcast %cst_5 : f32 to vector<8x512xf32>
    %7 = arith.maximumf %5, %6 : vector<8x512xf32>
    %8 = arith.truncf %7 : vector<8x512xf32> to vector<8x512xbf16>
    %c0_6 = arith.constant 0 : index
    %c0_7 = arith.constant 0 : index
    %9 = vector.load %arg3[%c0_6, %c0_7] : memref<512x256xbf16, #tpu.memory_space<vmem>>, vector<512x256xbf16>
    %cst_8 = arith.constant dense<0.000000e+00> : vector<8x256xf32>
    %10 = tpu.matmul %8, %9, %cst_8 {dimension_numbers = #tpu.dot_dimension_numbers<[1], [0], [0], [1], [0, 0, 1, 1], [], []>} : vector<8x512xbf16>, vector<512x256xbf16>, vector<8x256xf32> -> vector<8x256xf32>
    %c0_9 = arith.constant 0 : index
    %c0_10 = arith.constant 0 : index
    %11 = vector.load %arg4[%c0_9, %c0_10] : memref<1x256xf32, #tpu.memory_space<vmem>>, vector<1x256xf32>
    %12 = vector.broadcast %11 : vector<1x256xf32> to vector<8x256xf32>
    %13 = arith.addf %10, %12 : vector<8x256xf32>
    %cst_11 = arith.constant 0.000000e+00 : f32
    %14 = vector.broadcast %cst_11 : f32 to vector<8x256xf32>
    %15 = arith.maximumf %13, %14 : vector<8x256xf32>
    %16 = arith.truncf %15 : vector<8x256xf32> to vector<8x256xbf16>
    %c0_12 = arith.constant 0 : index
    %c0_13 = arith.constant 0 : index
    %17 = vector.load %arg5[%c0_12, %c0_13] : memref<256x128xbf16, #tpu.memory_space<vmem>>, vector<256x128xbf16>
    %cst_14 = arith.constant dense<0.000000e+00> : vector<8x128xf32>
    %18 = tpu.matmul %16, %17, %cst_14 {dimension_numbers = #tpu.dot_dimension_numbers<[1], [0], [0], [1], [0, 0, 1, 1], [], []>} : vector<8x256xbf16>, vector<256x128xbf16>, vector<8x128xf32> -> vector<8x128xf32>
    %c0_15 = arith.constant 0 : index
    %c0_16 = arith.constant 0 : index
    %19 = vector.load %arg6[%c0_15, %c0_16] : memref<1x128xf32, #tpu.memory_space<vmem>>, vector<1x128xf32>
    %20 = vector.broadcast %19 : vector<1x128xf32> to vector<8x128xf32>
    %21 = arith.addf %18, %20 : vector<8x128xf32>
    %c0_17 = arith.constant 0 : index
    %c0_18 = arith.constant 0 : index
    %22 = vector.load %arg7[%c0_17, %c0_18] : memref<8x128xf32, #tpu.memory_space<vmem>>, vector<8x128xf32>
    tpu.vector_store %arg7[%c0_17, %c0_18], %21 {strides = array<i32>} : memref<8x128xf32, #tpu.memory_space<vmem>>, vector<8x128xf32>,
    return
  }
}

</mosaic_0001>

<bundles_post_ra>
// kernel: tpu_custom_call.1
= control target key start
LH: loop header
LB: loop body
LE: loop exit
PB: predicated region body
PF: predicated region fallthrough
CT: control target
= control target key end

     0   :  { %12 = vsyncpa [#allocation3], 0  ;;  %s4061_s0 = inlined_call_operand.hbm [shape: bf16[8,784], index: 0, kind: input, shape index: {}]   ;;  %s4062_s1 = inlined_call_operand.hbm [shape: bf16[784,512], index: 1, kind: input, shape index: {}]   ;;  %s4063_s2 = inlined_call_operand.hbm [shape: f32[1,512], index: 2, kind: input, shape index: {}]   ;;  %s4064_s3 = inlined_call_operand.hbm [shape: bf16[512,256], index: 3, kind: input, shape index: {}]   ;;  %s4065_s4 = inlined_call_operand.vmem [shape: f32[1,256], index: 4, kind: input, shape index: {}]   ;;  %s4066_s5 = inlined_call_operand.hbm [shape: bf16[256,128], index: 5, kind: input, shape index: {}]   ;;  %s4067_s6 = inlined_call_operand.vmem [shape: f32[1,128], index: 6, kind: input, shape index: {}]   ;;  %s4068_s7 = inlined_call_operand.hbm [shape: f32[8,128], index: 7, kind: output, shape index: {}]  }
   0x1   :  { %13 = vsyncpa [#allocation6], 0 }
   0x2   :  { %14 = vsyncpa [#allocation9], 0  ;;  %s31_s26 = sshll.u32 %s4062_s1, 4  ;;  %s32_s26 = int_to_ptr.hbm [resolvable:$true] %s31_s26 }
   0x3   :  { %15 = vsyncpa [#allocation4], 0  ;;  %s3917_s27 = smov [#allocation5]   ;;  %s55_s8 = sshll.u32 %s4064_s3, 4  ;;  %s56_s8 = int_to_ptr.hbm [resolvable:$true] %s55_s8 }
   0x4   :  { %s33_s28 = sshll.u32 %s3917_s27, 4  ;;  %s3918_s9 = smov 256   ;;  %s34_s28 = int_to_ptr.vmem [resolvable:$true] %s33_s28 }
   0x5   :  { %s3919_s10 = smov 16   ;;  %s3920_s11 = smov [#allocation8]  }
   0x6   :  { %39 = dma.hbm_to_vmem [thread:$0]  %s32_s26, 25088, %s34_s28, [#allocation6], %s3918_s9, %s3918_s9, %s3919_s10  }
   0x7   :  { %s57_s12 = sshll.u32 %s3920_s11, 4  ;;  %s3921_s13 = smov 128   ;;  %s58_s12 = int_to_ptr.vmem [resolvable:$true] %s57_s12 }
   0x8   :  { %s3922_s14 = smov 8   ;;  %s21_s16 = sshll.u32 %s4061_s0, 4  ;;  %s22_s16 = int_to_ptr.hbm [resolvable:$true] %s21_s16 }
   0x9   :  { %63 = dma.hbm_to_vmem [thread:$0]  %s56_s8, 8192, %s58_s12, [#allocation9], %s3921_s13, %s3921_s13, %s3922_s14  }
   0xa   :  { %s3923_s17 = smov [#allocation2]   ;;  %s45_s20 = sshll.u32 %s4063_s2, 4  ;;  %s46_s20 = int_to_ptr.hbm [resolvable:$true] %s45_s20 }
   0xb   :  { %s23_s18 = sshll.u32 %s3923_s17, 4  ;;  %s3924_s21 = smov [#allocation7]   ;;  %s24_s18 = int_to_ptr.vmem [resolvable:$true] %s23_s18 }
   0xc   :  { %26 = dma.hbm_to_vmem [thread:$0]  %s22_s16, 448, %s24_s18, [#allocation3]  }
   0xd   :  { %s47_s22 = sshll.u32 %s3924_s21, 4  ;;  %s70_s25 = sshll.u32 %s4066_s5, 4  ;;  %s48_s22 = int_to_ptr.vmem [resolvable:$true] %s47_s22  ;;  %s71_s25 = int_to_ptr.hbm [resolvable:$true] %s70_s25 }
   0xe   :  { %50 = dma.hbm_to_vmem [thread:$0]  %s46_s20, 64, %s48_s22, [#allocation6]  }
   0xf   :  { %s3925_s0 = smov [#allocation10]   ;;  %s3926_s27 = smov 64  }
  0x10   :  { %s72_s26 = sshll.u32 %s3925_s0, 4  ;;  %s3927_s28 = smov 4   ;;  %s73_s26 = int_to_ptr.vmem [resolvable:$true] %s72_s26 }
  0x11   :  { %78 = dma.hbm_to_vmem [thread:$0]  %s71_s25, 2048, %s73_s26, [#allocation9], %s3926_s27, %s3926_s27, %s3927_s28  }
  0x12   :  { %3909 = dma.done.wait [#allocation3], 448  }
  0x13   :  { %3910 = vsyncadd [#allocation3], 4294966848 }
  0x14   :  { %3911 = dma.done.wait [#allocation6], 25152  }
  0x15   :  { %3912 = vsyncadd [#allocation6], 4294942144 }
  0x16   :  { %3913 = dma.done.wait [#allocation9], 10240  }
  0x17   :  { %3914 = vsyncadd [#allocation9], 4294957056  ;;  %v2482_v0 = vld [vmem:[#allocation5 + $0xe0] sm:$0xf]  ;;  %v3506_v1 = vld [vmem:[#allocation5 + $0xec] sm:$0xf0] }
  0x18   :  { %v2610_v2 = vld [vmem:[#allocation5 + $0x1e0] sm:$0xf]  ;;  %v2483_v3 = vor.u32 %v3506_v1, %v2482_v0  ;;  %v3538_v4 = vld [vmem:[#allocation5 + $0x1ec] sm:$0xf0]  ;;  %vm1316_vm0 = vcmask 130048   ;;  %s3928_s30 = smov [#allocation11]  }
  0x19   :  { %v2738_v5 = vld [vmem:[#allocation5 + $0x2e0] sm:$0xf]  ;;  %v3570_v6 = vld [vmem:[#allocation5 + $0x2ec] sm:$0xf0]  ;;  %v2611_v7 = vor.u32 %v3538_v4, %v2610_v2  ;;  %s2354_s8 = sshll.u32 %s3928_s30, 4  ;;  %s2356_s11 = sshll.u32 %s4068_s7, 4  ;;  %s2355_s8 = int_to_ptr.vmem [resolvable:$true] %s2354_s8  ;;  %s2357_s11 = int_to_ptr.hbm [resolvable:$true] %s2356_s11 }
  0x1a   :  { %v2739_v8 = vor.u32 %v3570_v6, %v2738_v5  ;;  %v2866_v9 = vld [vmem:[#allocation5 + $0x3e0] sm:$0xf]  ;;  %v3602_v10 = vld [vmem:[#allocation5 + $0x3ec] sm:$0xf0]  ;;  %1320 = vmatpush.bf16.msra.mxu0 %v2483_v3 }
  0x1b   :  { %v2466_v11 = vld [vmem:[#allocation5 + $0xc0] sm:$0xf]  ;;  %v2867_v12 = vor.u32 %v3602_v10, %v2866_v9  ;;  %v3502_v13 = vld [vmem:[#allocation5 + $0xcc] sm:$0xf0]  ;;  %1333 = vmatpush.bf16.msra.mxu1 %v2611_v7 }
  0x1c   :  { %v2594_v14 = vld [vmem:[#allocation5 + $0x1c0] sm:$0xf]  ;;  %v3534_v15 = vld [vmem:[#allocation5 + $0x1cc] sm:$0xf0]  ;;  %1346 = vmatpush.bf16.msra.mxu2 %v2739_v8  ;;  %v2467_v16 = vor.u32 %v3502_v13, %v2466_v11 }
  0x1d   :  { %v2595_v17 = vor.u32 %v3534_v15, %v2594_v14  ;;  %v2722_v18 = vld [vmem:[#allocation5 + $0x2c0] sm:$0xf]  ;;  %v3566_v19 = vld [vmem:[#allocation5 + $0x2cc] sm:$0xf0]  ;;  %1359 = vmatpush.bf16.msra.mxu3 %v2867_v12 }
  0x1e   :  { %v2850_v20 = vld [vmem:[#allocation5 + $0x3c0] sm:$0xf]  ;;  %v2723_v21 = vor.u32 %v3566_v19, %v2722_v18  ;;  %v3598_v22 = vld [vmem:[#allocation5 + $0x3cc] sm:$0xf0]  ;;  %1321 = vmatpush.bf16.msra.mxu0 %v2467_v16 }
  0x1f   :  { %v2450_v23 = vld [vmem:[#allocation5 + $0xa0] sm:$0xf]  ;;  %v3498_v24 = vld [vmem:[#allocation5 + $0xac] sm:$0xf0]  ;;  %v2851_v25 = vor.u32 %v3598_v22, %v2850_v20  ;;  %1334 = vmatpush.bf16.msra.mxu1 %v2595_v17 }
  0x20   :  { %v2578_v26 = vld [vmem:[#allocation5 + $0x1a0] sm:$0xf]  ;;  %v3530_v27 = vld [vmem:[#allocation5 + $0x1ac] sm:$0xf0]  ;;  %v2451_v29 = vor.u32 %v3498_v24, %v2450_v23  ;;  %1347 = vmatpush.bf16.msra.mxu2 %v2723_v21 }
  0x21   :  { %v2706_v28 = vld [vmem:[#allocation5 + $0x2a0] sm:$0xf]  ;;  %v3562_v30 = vld [vmem:[#allocation5 + $0x2ac] sm:$0xf0]  ;;  %v2579_v33 = vor.u32 %v3530_v27, %v2578_v26  ;;  %1360 = vmatpush.bf16.msra.mxu3 %v2851_v25 }
  0x22   :  { %v2834_v31 = vld [vmem:[#allocation5 + $0x3a0] sm:$0xf]  ;;  %v3594_v32 = vld [vmem:[#allocation5 + $0x3ac] sm:$0xf0]  ;;  %v2707_v34 = vor.u32 %v3562_v30, %v2706_v28  ;;  %1322 = vmatpush.bf16.msra.mxu0 %v2451_v29 }
  0x23   :  { %v2434_v35 = vld [vmem:[#allocation5 + $0x80] sm:$0xf]  ;;  %v3494_v36 = vld [vmem:[#allocation5 + $0x8c] sm:$0xf0]  ;;  %v2835_v38 = vor.u32 %v3594_v32, %v2834_v31  ;;  %1335 = vmatpush.bf16.msra.mxu1 %v2579_v33 }
  0x24   :  { %v2562_v37 = vld [vmem:[#allocation5 + $0x180] sm:$0xf]  ;;  %v3526_v39 = vld [vmem:[#allocation5 + $0x18c] sm:$0xf0]  ;;  %v2435_v44 = vor.u32 %v3494_v36, %v2434_v35  ;;  %1348 = vmatpush.bf16.msra.mxu2 %v2707_v34  ;;  %v3504_v34 = vld [vmem:[#allocation5 + $0xe4] sm:$0xf] }
  0x25   :  { %v2690_v40 = vld [vmem:[#allocation5 + $0x280] sm:$0xf]  ;;  %v3558_v41 = vld [vmem:[#allocation5 + $0x28c] sm:$0xf0]  ;;  %v2563_v45 = vor.u32 %v3526_v39, %v2562_v37  ;;  %1361 = vmatpush.bf16.msra.mxu3 %v2835_v38  ;;  %v2484_v35 = vld [vmem:[#allocation5 + $0xf0] sm:$0xf0] }
  0x26   :  { %v2818_v42 = vld [vmem:[#allocation5 + $0x380] sm:$0xf]  ;;  %v3590_v43 = vld [vmem:[#allocation5 + $0x38c] sm:$0xf0]  ;;  %v2691_v46 = vor.u32 %v3558_v41, %v2690_v40  ;;  %1323 = vmatpush.bf16.msra.mxu0 %v2435_v44  ;;  %v102_v37 = vld [vmem:[#allocation2] sm:$0xff] }
  0x27   :  { %v2418_v47 = vld [vmem:[#allocation5 + $0x60] sm:$0xf]  ;;  %v3490_v48 = vld [vmem:[#allocation5 + $0x6c] sm:$0xf0]  ;;  %v2819_v50 = vor.u32 %v3590_v43, %v2818_v42  ;;  %1336 = vmatpush.bf16.msra.mxu1 %v2563_v45  ;;  %v316_v41 = vunpack.c.l.b16 %v102_v37 }
  0x28   :  { %v2546_v49 = vld [vmem:[#allocation5 + $0x160] sm:$0xf]  ;;  %v3522_v51 = vld [vmem:[#allocation5 + $0x16c] sm:$0xf0]  ;;  %v2419_v56 = vor.u32 %v3490_v48, %v2418_v47  ;;  %1349 = vmatpush.bf16.msra.mxu2 %v2691_v46  ;;  %v3536_v46 = vld [vmem:[#allocation5 + $0x1e4] sm:$0xf] }
  0x29   :  { %v2674_v52 = vld [vmem:[#allocation5 + $0x260] sm:$0xf]  ;;  %v3554_v53 = vld [vmem:[#allocation5 + $0x26c] sm:$0xf0]  ;;  %v2547_v57 = vor.u32 %v3522_v51, %v2546_v49  ;;  %1362 = vmatpush.bf16.msra.mxu3 %v2819_v50  ;;  %v2612_v47 = vld [vmem:[#allocation5 + $0x1f0] sm:$0xf0]  ;;  %v2487_v49 = vor.u32 %v3504_v34, %v2484_v35 }
  0x2a   :  { %v2802_v54 = vld [vmem:[#allocation5 + $0x360] sm:$0xf]  ;;  %v3586_v55 = vld [vmem:[#allocation5 + $0x36c] sm:$0xf0]  ;;  %v2675_v58 = vor.u32 %v3554_v53, %v2674_v52  ;;  %1324 = vmatpush.bf16.msra.mxu0 %v2419_v56  ;;  %v2468_v56 = vld [vmem:[#allocation5 + $0xd0] sm:$0xf0] }
  0x2b   :  { %v2402_v59 = vld [vmem:[#allocation5 + $0x40] sm:$0xf]  ;;  %v3486_v60 = vld [vmem:[#allocation5 + $0x4c] sm:$0xf0]  ;;  %v2803_v62 = vor.u32 %v3586_v55, %v2802_v54  ;;  %1337 = vmatpush.bf16.msra.mxu1 %v2547_v57  ;;  %v3500_v55 = vld [vmem:[#allocation5 + $0xc4] sm:$0xf]  ;;  %v3986_v57 = vpack.c.b16 %v316_v41, %v316_v41 }
  0x2c   :  { %v2530_v61 = vld [vmem:[#allocation5 + $0x140] sm:$0xf]  ;;  %v3518_v63 = vld [vmem:[#allocation5 + $0x14c] sm:$0xf0]  ;;  %v2403_v4 = vor.u32 %v3486_v60, %v2402_v59  ;;  %1350 = vmatpush.bf16.msra.mxu2 %v2675_v58  ;;  %v317_v58 = vunpack.c.h.b16 %v102_v37  ;;  %v2420_v34 = vld [vmem:[#allocation5 + $0x70] sm:$0xf0] }
  0x2d   :  { %v2658_v0 = vld [vmem:[#allocation5 + $0x240] sm:$0xf]  ;;  %v3550_v1 = vld [vmem:[#allocation5 + $0x24c] sm:$0xf0]  ;;  %v2531_v5 = vor.u32 %v3518_v63, %v2530_v61  ;;  %1363 = vmatpush.bf16.msra.mxu3 %v2803_v62  ;;  %v2615_v61 = vor.u32 %v3536_v46, %v2612_v47  ;;  %v3532_v63 = vld [vmem:[#allocation5 + $0x1c4] sm:$0xf] }
  0x2e   :  { %v2786_v2 = vld [vmem:[#allocation5 + $0x340] sm:$0xf]  ;;  %v3582_v3 = vld [vmem:[#allocation5 + $0x34c] sm:$0xf0]  ;;  %v2659_v6 = vor.u32 %v3550_v1, %v2658_v0  ;;  %1325 = vmatpush.bf16.msra.mxu0 %v2403_v4  ;;  %v2596_v0 = vld [vmem:[#allocation5 + $0x1d0] sm:$0xf0] }
  0x2f   :  { %v2386_v7 = vld [vmem:[#allocation5 + $0x20] sm:$0xf]  ;;  %v3482_v8 = vld [vmem:[#allocation5 + $0x2c] sm:$0xf0]  ;;  %v2787_v10 = vor.u32 %v3582_v3, %v2786_v2  ;;  %1338 = vmatpush.bf16.msra.mxu1 %v2531_v5  ;;  %v2471_v2 = vor.u32 %v3500_v55, %v2468_v56  ;;  %v3484_v46 = vld [vmem:[#allocation5 + $0x44] sm:$0xf] }
  0x30   :  { %v2514_v9 = vld [vmem:[#allocation5 + $0x120] sm:$0xf]  ;;  %v3514_v11 = vld [vmem:[#allocation5 + $0x12c] sm:$0xf0]  ;;  %v2387_v17 = vor.u32 %v3482_v8, %v2386_v7  ;;  %1351 = vmatpush.bf16.msra.mxu2 %v2659_v6  ;;  %v3992_v6 = vpack.c.b16 %v317_v58, %v317_v58  ;;  %v3496_v8 = vld [vmem:[#allocation5 + $0xa4] sm:$0xf] }
  0x31   :  { %v2642_v12 = vld [vmem:[#allocation5 + $0x220] sm:$0xf]  ;;  %v3546_v13 = vld [vmem:[#allocation5 + $0x22c] sm:$0xf0]  ;;  %v2515_v21 = vor.u32 %v3514_v11, %v2514_v9  ;;  %1364 = vmatpush.bf16.msra.mxu3 %v2787_v10  ;;  %v2452_v9 = vld [vmem:[#allocation5 + $0xb0] sm:$0xf0]  ;;  %v2599_v10 = vor.u32 %v3532_v63, %v2596_v0 }
  0x32   :  { %v2770_v14 = vld [vmem:[#allocation5 + $0x320] sm:$0xf]  ;;  %v3578_v15 = vld [vmem:[#allocation5 + $0x32c] sm:$0xf0]  ;;  %v2643_v22 = vor.u32 %v3546_v13, %v2642_v12  ;;  %1326 = vmatpush.bf16.msra.mxu0 %v2387_v17  ;;  %v3528_v12 = vld [vmem:[#allocation5 + $0x1a4] sm:$0xf] }
  0x33   :  { %v2370_v16 = vld [vmem:[#allocation5] sm:$0xf]  ;;  %v3478_v18 = vld [vmem:[#allocation5 + $0xc] sm:$0xf0]  ;;  %v2771_v26 = vor.u32 %v3578_v15, %v2770_v14  ;;  %1339 = vmatpush.bf16.msra.mxu1 %v2515_v21  ;;  %v2580_v13 = vld [vmem:[#allocation5 + $0x1b0] sm:$0xf0]  ;;  %v2455_v15 = vor.u32 %v3496_v8, %v2452_v9 }
  0x34   :  { %v2498_v19 = vld [vmem:[#allocation5 + $0x100] sm:$0xf]  ;;  %v3510_v20 = vld [vmem:[#allocation5 + $0x10c] sm:$0xf0]  ;;  %v2371_v33 = vor.u32 %v3478_v18, %v2370_v16  ;;  %1352 = vmatpush.bf16.msra.mxu2 %v2643_v22  ;;  %v2436_v21 = vld [vmem:[#allocation5 + $0x90] sm:$0xf0] }
  0x35   :  { %v2626_v23 = vld [vmem:[#allocation5 + $0x200] sm:$0xf]  ;;  %v3542_v24 = vld [vmem:[#allocation5 + $0x20c] sm:$0xf0]  ;;  %v2499_v38 = vor.u32 %v3510_v20, %v2498_v19  ;;  %1365 = vmatpush.bf16.msra.mxu3 %v2771_v26  ;;  %v3492_v20 = vld [vmem:[#allocation5 + $0x84] sm:$0xf] }
  0x36   :  { %v103_v25 = vld [vmem:[#allocation2 + $0x8] sm:$0xff]  ;;  %v2754_v27 = vld [vmem:[#allocation5 + $0x300] sm:$0xf]  ;;  %v2627_v39 = vor.u32 %v3542_v24, %v2626_v23  ;;  %1327 = vmatpush.bf16.msra.mxu0 %v2371_v33  ;;  %v105_v22 = vld [vmem:[#allocation2 + $0x18] sm:$0xf]  ;;  %v2583_v23 = vor.u32 %v3528_v12, %v2580_v13 }
  0x37   :  { %v3574_v28 = vld [vmem:[#allocation5 + $0x30c] sm:$0xf0]  ;;  %v2994_v29 = vld [vmem:[#allocation5 + $0x4e0] sm:$0xf]  ;;  %v318_v36 = vunpack.c.l.b16 %v103_v25  ;;  %v319_v42 = vunpack.c.h.b16 %v103_v25  ;;  %1340 = vmatpush.bf16.msra.mxu1 %v2499_v38  ;;  %v3524_v25 = vld [vmem:[#allocation5 + $0x184] sm:$0xf]  ;;  %v322_v35 = vunpack.c.l.b16 %v105_v22 }
  0x38   :  { %v3634_v30 = vld [vmem:[#allocation5 + $0x4ec] sm:$0xf0]  ;;  %v3122_v31 = vld [vmem:[#allocation5 + $0x5e0] sm:$0xf]  ;;  %v2755_v43 = vor.u32 %v3574_v28, %v2754_v27  ;;  %1353 = vmatpush.bf16.msra.mxu2 %v2627_v39  ;;  %v2564_v26 = vld [vmem:[#allocation5 + $0x190] sm:$0xf0]  ;;  %v2439_v28 = vor.u32 %v3492_v20, %v2436_v21 }
  0x39   :  { %v3666_v32 = vld [vmem:[#allocation5 + $0x5ec] sm:$0xf0]  ;;  %v3138_v40 = vld [vmem:[#allocation5 + $0x600] sm:$0xf]  ;;  %v2995_v44 = vor.u32 %v3634_v30, %v2994_v29  ;;  %v3984_v53 = vpack.c.b16 %v318_v36, %v318_v36  ;;  %v3988_v60 = vpack.c.b16 %v319_v42, %v319_v42  ;;  %1328 = vmatmul.bf16.vlgmr.msra.gmra.mxu0 %v3986_v57  ;;  %v3488_v33 = vld [vmem:[#allocation5 + $0x64] sm:$0xf]  ;;  %v2567_v36 = vor.u32 %v3524_v25, %v2564_v26 }
  0x3a   :  { %v3670_v45 = vld [vmem:[#allocation5 + $0x60c] sm:$0xf0]  ;;  %v3123_v48 = vor.u32 %v3666_v32, %v3122_v31  ;;  %v2978_v50 = vld [vmem:[#allocation5 + $0x4c0] sm:$0xf]  ;;  %1366 = vmatpush.bf16.msra.mxu3 %v2755_v43  ;;  %1341 = vmatmul.bf16.vlgmr.msra.gmra.mxu1 %v3992_v6  ;;  %v3520_v38 = vld [vmem:[#allocation5 + $0x164] sm:$0xf]  ;;  %v2423_v41 = vor.u32 %v3488_v33, %v2420_v34 }
  0x3b   :  { %v3630_v51 = vld [vmem:[#allocation5 + $0x4cc] sm:$0xf0]  ;;  %v3106_v52 = vld [vmem:[#allocation5 + $0x5c0] sm:$0xf]  ;;  %v3139_v59 = vor.u32 %v3670_v45, %v3138_v40  ;;  %1372 = vmatpush.bf16.msrb.mxu0 %v2995_v44  ;;  %1354 = vmatmul.bf16.vlgmr.msra.gmra.mxu2 %v3984_v53  ;;  %v2548_v39 = vld [vmem:[#allocation5 + $0x170] sm:$0xf0] }
  0x3c   :  { %v3662_v54 = vld [vmem:[#allocation5 + $0x5cc] sm:$0xf0]  ;;  %v2979_v62 = vor.u32 %v3630_v51, %v2978_v50  ;;  %1385 = vmatpush.bf16.msrb.mxu1 %v3123_v48  ;;  %v2962_v3 = vld [vmem:[#allocation5 + $0x4a0] sm:$0xf]  ;;  %v2404_v47 = vld [vmem:[#allocation5 + $0x50] sm:$0xf0]  ;;  %v3996_v48 = vpack.c.b16 %v322_v35, %v322_v35 }
  0x3d   :  { %v3107_v1 = vor.u32 %v3662_v54, %v3106_v52  ;;  %v3626_v4 = vld [vmem:[#allocation5 + $0x4ac] sm:$0xf0]  ;;  %v3090_v5 = vld [vmem:[#allocation5 + $0x5a0] sm:$0xf]  ;;  %1405 = vmatpush.bf16.msrb.mxu2 %v3139_v59  ;;  %1367 = vmatmul.bf16.vlgmr.msra.gmra.mxu3 %v3988_v60  ;;  %v3516_v51 = vld [vmem:[#allocation5 + $0x144] sm:$0xf]  ;;  %v2407_v55 = vor.u32 %v3484_v46, %v2404_v47 }
  0x3e   :  { %1411 = vmatpush.bf16.msrb.mxu3 %v2487_v49  ;;  %v3658_v7 = vld [vmem:[#allocation5 + $0x5ac] sm:$0xf0]  ;;  %v2963_v11 = vor.u32 %v3626_v4, %v2962_v3  ;;  %v2946_v16 = vld [vmem:[#allocation5 + $0x480] sm:$0xf]  ;;  %v2551_v49 = vor.u32 %v3520_v38, %v2548_v39  ;;  %v2532_v52 = vld [vmem:[#allocation5 + $0x150] sm:$0xf0] }
  0x3f   :  { %1373 = vmatpush.bf16.msrb.mxu0 %v2979_v62  ;;  %v3091_v14 = vor.u32 %v3658_v7, %v3090_v5  ;;  %v3622_v17 = vld [vmem:[#allocation5 + $0x48c] sm:$0xf0]  ;;  %v3074_v18 = vld [vmem:[#allocation5 + $0x580] sm:$0xf]  ;;  %v3480_v62 = vld [vmem:[#allocation5 + $0x24] sm:$0xf] }
  0x40   :  { %1386 = vmatpush.bf16.msrb.mxu1 %v3107_v1  ;;  %v3654_v19 = vld [vmem:[#allocation5 + $0x58c] sm:$0xf0]  ;;  %v2947_v24 = vor.u32 %v3622_v17, %v2946_v16  ;;  %v2930_v29 = vld [vmem:[#allocation5 + $0x460] sm:$0xf]  ;;  %v2388_v63 = vld [vmem:[#allocation5 + $0x30] sm:$0xf0]  ;;  %v2535_v1 = vor.u32 %v3516_v51, %v2532_v52 }
  0x41   :  { %1424 = vmatpush.bf16.msra.mxu2 %v2615_v61  ;;  %v3075_v27 = vor.u32 %v3654_v19, %v3074_v18  ;;  %v3618_v30 = vld [vmem:[#allocation5 + $0x46c] sm:$0xf0]  ;;  %v3058_v31 = vld [vmem:[#allocation5 + $0x560] sm:$0xf]  ;;  %v3512_v0 = vld [vmem:[#allocation5 + $0x124] sm:$0xf]  ;;  %v2391_v8 = vor.u32 %v3480_v62, %v2388_v63 }
  0x42   :  { %1412 = vmatpush.bf16.msrb.mxu3 %v2471_v2  ;;  %v3650_v32 = vld [vmem:[#allocation5 + $0x56c] sm:$0xf0]  ;;  %v2931_v37 = vor.u32 %v3618_v30, %v2930_v29  ;;  %v2914_v42 = vld [vmem:[#allocation5 + $0x440] sm:$0xf]  ;;  %v2516_v3 = vld [vmem:[#allocation5 + $0x130] sm:$0xf0] }
  0x43   :  { %1374 = vmatpush.bf16.msrb.mxu0 %v2963_v11  ;;  %v3059_v40 = vor.u32 %v3650_v32, %v3058_v31  ;;  %v3614_v43 = vld [vmem:[#allocation5 + $0x44c] sm:$0xf0]  ;;  %v3042_v44 = vld [vmem:[#allocation5 + $0x540] sm:$0xf]  ;;  %v104_v5 = vld [vmem:[#allocation2 + $0x10] sm:$0xff]  ;;  %v2519_v19 = vor.u32 %v3512_v0, %v2516_v3 }
  0x44   :  { %1387 = vmatpush.bf16.msrb.mxu1 %v3091_v14  ;;  %v3646_v45 = vld [vmem:[#allocation5 + $0x54c] sm:$0xf0]  ;;  %v2915_v50 = vor.u32 %v3614_v43, %v2914_v42  ;;  %v2898_v56 = vld [vmem:[#allocation5 + $0x420] sm:$0xf]  ;;  %v3476_v12 = vld [vmem:[#allocation5 + $0x4] sm:$0xf]  ;;  %v320_v18 = vunpack.c.l.b16 %v104_v5 }
  0x45   :  { %1425 = vmatpush.bf16.msra.mxu2 %v2599_v10  ;;  %v3043_v54 = vor.u32 %v3646_v45, %v3042_v44  ;;  %v3610_v58 = vld [vmem:[#allocation5 + $0x42c] sm:$0xf0]  ;;  %v3026_v59 = vld [vmem:[#allocation5 + $0x520] sm:$0xf]  ;;  %v2372_v13 = vld [vmem:[#allocation5 + $0x10] sm:$0xf0] }
  0x46   :  { %1413 = vmatpush.bf16.msrb.mxu3 %v2455_v15  ;;  %v3642_v61 = vld [vmem:[#allocation5 + $0x52c] sm:$0xf0]  ;;  %v2899_v2 = vor.u32 %v3610_v58, %v2898_v56  ;;  %v2882_v4 = vld [vmem:[#allocation5 + $0x400] sm:$0xf]  ;;  %v3568_v14 = vld [vmem:[#allocation5 + $0x2e4] sm:$0xf]  ;;  %v2375_v25 = vor.u32 %v3476_v12, %v2372_v13  ;;  %v4000_v34 = vpack.c.b16 %v320_v18, %v320_v18 }
  0x47   :  { %1375 = vmatpush.bf16.msrb.mxu0 %v2947_v24  ;;  %v3027_v7 = vor.u32 %v3642_v61, %v3026_v59  ;;  %v3606_v9 = vld [vmem:[#allocation5 + $0x40c] sm:$0xf0]  ;;  %v3010_v10 = vld [vmem:[#allocation5 + $0x500] sm:$0xf]  ;;  %v2740_v15 = vld [vmem:[#allocation5 + $0x2f0] sm:$0xf0] }
  0x48   :  { %1388 = vmatpush.bf16.msrb.mxu1 %v3075_v27  ;;  %v3638_v11 = vld [vmem:[#allocation5 + $0x50c] sm:$0xf0]  ;;  %v3600_v16 = vld [vmem:[#allocation5 + $0x3e4] sm:$0xf]  ;;  %v2868_v17 = vld [vmem:[#allocation5 + $0x3f0] sm:$0xf0]  ;;  %v2883_v20 = vor.u32 %v3606_v9, %v2882_v4 }
  0x49   :  { %1426 = vmatpush.bf16.msra.mxu2 %v2583_v23  ;;  %v3632_v21 = vld [vmem:[#allocation5 + $0x4e4] sm:$0xf]  ;;  %v2996_v22 = vld [vmem:[#allocation5 + $0x4f0] sm:$0xf0]  ;;  %v321_v23 = vunpack.c.h.b16 %v104_v5  ;;  %v3011_v24 = vor.u32 %v3638_v11, %v3010_v10  ;;  %v2871_v29 = vor.u32 %v3600_v16, %v2868_v17 }
  0x4a   :  { %1414 = vmatpush.bf16.msrb.mxu3 %v2439_v28  ;;  %v3508_v26 = vld [vmem:[#allocation5 + $0x104] sm:$0xf]  ;;  %v2500_v27 = vld [vmem:[#allocation5 + $0x110] sm:$0xf0]  ;;  %v2743_v28 = vor.u32 %v3568_v14, %v2740_v15  ;;  %v2999_v33 = vor.u32 %v3632_v21, %v2996_v22 }
  0x4b   :  { %1376 = vmatpush.bf16.msrb.mxu0 %v2931_v37  ;;  %3152 = vmatmul.msk.bf16.vlgmr.msrb.gmra.mxu2 %vm1316_vm0, %v3996_v48  ;;  %v3664_v30 = vld [vmem:[#allocation5 + $0x5e4] sm:$0xf]  ;;  %v3124_v31 = vld [vmem:[#allocation5 + $0x5f0] sm:$0xf0]  ;;  %v2503_v38 = vor.u32 %v3508_v26, %v2500_v27  ;;  %v4002_v39 = vpack.c.b16 %v321_v23, %v321_v23 }
  0x4c   :  { %1389 = vmatpush.bf16.msrb.mxu1 %v3059_v40  ;;  %v3564_v32 = vld [vmem:[#allocation5 + $0x2c4] sm:$0xf]  ;;  %v2724_v35 = vld [vmem:[#allocation5 + $0x2d0] sm:$0xf0]  ;;  %v3127_v42 = vor.u32 %v3664_v30, %v3124_v31 }
  0x4d   :  { %1427 = vmatpush.bf16.msra.mxu2 %v2567_v36  ;;  %v3596_v36 = vld [vmem:[#allocation5 + $0x3c4] sm:$0xf]  ;;  %v2852_v37 = vld [vmem:[#allocation5 + $0x3d0] sm:$0xf0]  ;;  %v2727_v43 = vor.u32 %v3564_v32, %v2724_v35 }
  0x4e   :  { %1415 = vmatpush.bf16.msrb.mxu3 %v2423_v41  ;;  %v3628_v40 = vld [vmem:[#allocation5 + $0x4c4] sm:$0xf]  ;;  %v2980_v41 = vld [vmem:[#allocation5 + $0x4d0] sm:$0xf0]  ;;  %v2855_v44 = vor.u32 %v3596_v36, %v2852_v37 }
  0x4f   :  { %1377 = vmatpush.bf16.msrb.mxu0 %v2915_v50  ;;  %v3660_v45 = vld [vmem:[#allocation5 + $0x5c4] sm:$0xf]  ;;  %v3108_v46 = vld [vmem:[#allocation5 + $0x5d0] sm:$0xf0] }
  0x50   :  { %1390 = vmatpush.bf16.msrb.mxu1 %v3043_v54  ;;  %v3560_v47 = vld [vmem:[#allocation5 + $0x2a4] sm:$0xf]  ;;  %v2708_v50 = vld [vmem:[#allocation5 + $0x2b0] sm:$0xf0]  ;;  %v3111_v56 = vor.u32 %v3660_v45, %v3108_v46 }
  0x51   :  { %1428 = vmatpush.bf16.msra.mxu2 %v2551_v49  ;;  %v2983_v49 = vor.u32 %v3628_v40, %v2980_v41  ;;  %v3592_v51 = vld [vmem:[#allocation5 + $0x3a4] sm:$0xf]  ;;  %v2836_v52 = vld [vmem:[#allocation5 + $0x3b0] sm:$0xf0]  ;;  %v2711_v58 = vor.u32 %v3560_v47, %v2708_v50 }
  0x52   :  { %1416 = vmatpush.bf16.msrb.mxu3 %v2407_v55  ;;  %v3624_v54 = vld [vmem:[#allocation5 + $0x4a4] sm:$0xf]  ;;  %v2964_v55 = vld [vmem:[#allocation5 + $0x4b0] sm:$0xf0]  ;;  %v2839_v59 = vor.u32 %v3592_v51, %v2836_v52 }
  0x53   :  { %1378 = vmatpush.bf16.msrb.mxu0 %v2899_v2  ;;  %v3656_v61 = vld [vmem:[#allocation5 + $0x5a4] sm:$0xf]  ;;  %v3092_v62 = vld [vmem:[#allocation5 + $0x5b0] sm:$0xf0]  ;;  %v2967_v0 = vor.u32 %v3624_v54, %v2964_v55 }
  0x54   :  { %1391 = vmatpush.bf16.msrb.mxu1 %v3027_v7  ;;  %v3556_v63 = vld [vmem:[#allocation5 + $0x284] sm:$0xf]  ;;  %v2820_v3 = vld [vmem:[#allocation5 + $0x390] sm:$0xf0]  ;;  %v3095_v7 = vor.u32 %v3656_v61, %v3092_v62  ;;  %v2490_v61 = vld [vmem:[#allocation5 + $0xe8] sm:$0xf] }
  0x55   :  { %1429 = vmatpush.bf16.msra.mxu2 %v2535_v1  ;;  %v2692_v1 = vld [vmem:[#allocation5 + $0x290] sm:$0xf0]  ;;  %v3588_v2 = vld [vmem:[#allocation5 + $0x384] sm:$0xf]  ;;  %v3507_v62 = vld [vmem:[#allocation5 + $0xf4] sm:$0xf0] }
  0x56   :  { %1417 = vmatpush.bf16.msrb.mxu3 %v2391_v8  ;;  %v3620_v4 = vld [vmem:[#allocation5 + $0x484] sm:$0xf]  ;;  %v2948_v5 = vld [vmem:[#allocation5 + $0x490] sm:$0xf0]  ;;  %v2695_v8 = vor.u32 %v3556_v63, %v2692_v1  ;;  %v2823_v9 = vor.u32 %v3588_v2, %v2820_v3  ;;  %v2618_v63 = vld [vmem:[#allocation5 + $0x1e8] sm:$0xf] }
  0x57   :  { %1379 = vmatpush.bf16.msrb.mxu0 %v2883_v20  ;;  %v3652_v10 = vld [vmem:[#allocation5 + $0x584] sm:$0xf]  ;;  %v3076_v11 = vld [vmem:[#allocation5 + $0x590] sm:$0xf0]  ;;  %v2951_v13 = vor.u32 %v3620_v4, %v2948_v5  ;;  %v3539_v1 = vld [vmem:[#allocation5 + $0x1f4] sm:$0xf0] }
  0x58   :  { %1392 = vmatpush.bf16.msrb.mxu1 %v3011_v24  ;;  %v3552_v12 = vld [vmem:[#allocation5 + $0x264] sm:$0xf]  ;;  %v2676_v14 = vld [vmem:[#allocation5 + $0x270] sm:$0xf0] }
  0x59   :  { %1430 = vmatpush.bf16.msra.mxu2 %v2519_v19  ;;  %v3584_v15 = vld [vmem:[#allocation5 + $0x364] sm:$0xf]  ;;  %v2804_v16 = vld [vmem:[#allocation5 + $0x370] sm:$0xf0]  ;;  %v3079_v19 = vor.u32 %v3652_v10, %v3076_v11  ;;  %v2679_v20 = vor.u32 %v3552_v12, %v2676_v14  ;;  %v2491_v10 = vor.u32 %v3507_v62, %v2490_v61  ;;  %v2874_v11 = vld [vmem:[#allocation5 + $0x3e8] sm:$0xf]  ;;  %v2619_v14 = vor.u32 %v3539_v1, %v2618_v63 }
  0x5a   :  { %1418 = vmatpush.bf16.msrb.mxu3 %v2375_v25  ;;  %1380 = vmatmul.bf16.vlgmr.msrb.gmra.mxu0 %v4000_v34  ;;  %v3616_v17 = vld [vmem:[#allocation5 + $0x464] sm:$0xf]  ;;  %v2932_v18 = vld [vmem:[#allocation5 + $0x470] sm:$0xf0]  ;;  %v2807_v21 = vor.u32 %v3584_v15, %v2804_v16  ;;  %v3603_v12 = vld [vmem:[#allocation5 + $0x3f4] sm:$0xf0] }
  0x5b   :  { %1437 = vmatpush.bf16.msra.mxu0 %v2743_v28  ;;  %1393 = vmatmul.bf16.vlgmr.msrb.gmra.mxu1 %v4002_v39  ;;  %v3648_v22 = vld [vmem:[#allocation5 + $0x564] sm:$0xf]  ;;  %v3060_v23 = vld [vmem:[#allocation5 + $0x570] sm:$0xf0]  ;;  %v2935_v25 = vor.u32 %v3616_v17, %v2932_v18  ;;  %v3503_v15 = vld [vmem:[#allocation5 + $0xd4] sm:$0xf0] }
  0x5c   :  { %1450 = vmatpush.bf16.msra.mxu1 %v2871_v29  ;;  %v3548_v24 = vld [vmem:[#allocation5 + $0x244] sm:$0xf]  ;;  %v2660_v26 = vld [vmem:[#allocation5 + $0x250] sm:$0xf0]  ;;  %v3063_v31 = vor.u32 %v3648_v22, %v3060_v23  ;;  %v2746_v17 = vld [vmem:[#allocation5 + $0x2e8] sm:$0xf]  ;;  %v2875_v22 = vor.u32 %v3603_v12, %v2874_v11 }
  0x5d   :  { %1431 = vmatpush.bf16.msra.mxu2 %v2503_v38  ;;  %1419 = vmatmul.bf16.vlgmr.msrb.gmra.mxu3 %v3986_v57  ;;  %v3580_v27 = vld [vmem:[#allocation5 + $0x344] sm:$0xf]  ;;  %v2788_v28 = vld [vmem:[#allocation5 + $0x350] sm:$0xf0]  ;;  %v3571_v18 = vld [vmem:[#allocation5 + $0x2f4] sm:$0xf0] }
  0x5e   :  { %1463 = vmatpush.bf16.msra.mxu3 %v2999_v33  ;;  %v3612_v29 = vld [vmem:[#allocation5 + $0x444] sm:$0xf]  ;;  %v2916_v30 = vld [vmem:[#allocation5 + $0x450] sm:$0xf0]  ;;  %v2663_v33 = vor.u32 %v3548_v24, %v2660_v26  ;;  %v2791_v35 = vor.u32 %v3580_v27, %v2788_v28  ;;  %v2858_v24 = vld [vmem:[#allocation5 + $0x3c8] sm:$0xf]  ;;  %v2747_v27 = vor.u32 %v3571_v18, %v2746_v17 }
  0x5f   :  { %1438 = vmatpush.bf16.msra.mxu0 %v2727_v43  ;;  %v3644_v32 = vld [vmem:[#allocation5 + $0x544] sm:$0xf]  ;;  %v3044_v36 = vld [vmem:[#allocation5 + $0x550] sm:$0xf0]  ;;  %v2919_v40 = vor.u32 %v3612_v29, %v2916_v30  ;;  %v2458_v26 = vld [vmem:[#allocation5 + $0xa8] sm:$0xf] }
  0x60   :  { %1451 = vmatpush.bf16.msra.mxu1 %v2855_v44  ;;  %1432 = vmatmul.bf16.vlgmr.msra.gmra.mxu2 %v3992_v6  ;;  %v3544_v37 = vld [vmem:[#allocation5 + $0x224] sm:$0xf]  ;;  %v2644_v38 = vld [vmem:[#allocation5 + $0x230] sm:$0xf0]  ;;  %v3047_v45 = vor.u32 %v3644_v32, %v3044_v36  ;;  %v3499_v29 = vld [vmem:[#allocation5 + $0xb4] sm:$0xf0] }
  0x61   :  { %1476 = vmatpush.bf16.msrb.mxu2 %v3127_v42  ;;  %v3576_v41 = vld [vmem:[#allocation5 + $0x324] sm:$0xf]  ;;  %v2772_v42 = vld [vmem:[#allocation5 + $0x330] sm:$0xf0]  ;;  %v2730_v30 = vld [vmem:[#allocation5 + $0x2c8] sm:$0xf]  ;;  %v2459_v36 = vor.u32 %v3499_v29, %v2458_v26 }
  0x62   :  { %1464 = vmatpush.bf16.msra.mxu3 %v2983_v49  ;;  %v3608_v43 = vld [vmem:[#allocation5 + $0x424] sm:$0xf]  ;;  %v2900_v44 = vld [vmem:[#allocation5 + $0x430] sm:$0xf0]  ;;  %v2647_v49 = vor.u32 %v3544_v37, %v2644_v38  ;;  %v2775_v50 = vor.u32 %v3576_v41, %v2772_v42  ;;  %v2586_v32 = vld [vmem:[#allocation5 + $0x1a8] sm:$0xf] }
  0x63   :  { %1439 = vmatpush.bf16.msra.mxu0 %v2711_v58  ;;  %v3640_v46 = vld [vmem:[#allocation5 + $0x524] sm:$0xf]  ;;  %v3028_v47 = vld [vmem:[#allocation5 + $0x530] sm:$0xf0]  ;;  %v2903_v55 = vor.u32 %v3608_v43, %v2900_v44  ;;  %v2842_v37 = vld [vmem:[#allocation5 + $0x3a8] sm:$0xf] }
  0x64   :  { %1452 = vmatpush.bf16.msra.mxu1 %v2839_v59  ;;  %v3540_v51 = vld [vmem:[#allocation5 + $0x204] sm:$0xf]  ;;  %v2628_v52 = vld [vmem:[#allocation5 + $0x210] sm:$0xf0]  ;;  %v3595_v38 = vld [vmem:[#allocation5 + $0x3b4] sm:$0xf0] }
  0x65   :  { %1477 = vmatpush.bf16.msrb.mxu2 %v3111_v56  ;;  %v3572_v54 = vld [vmem:[#allocation5 + $0x304] sm:$0xf]  ;;  %v2756_v56 = vld [vmem:[#allocation5 + $0x310] sm:$0xf0]  ;;  %v2631_v4 = vor.u32 %v3540_v51, %v2628_v52  ;;  %v3495_v43 = vld [vmem:[#allocation5 + $0x94] sm:$0xf0] }
  0x66   :  { %1465 = vmatpush.bf16.msra.mxu3 %v2967_v0  ;;  %v3604_v58 = vld [vmem:[#allocation5 + $0x404] sm:$0xf]  ;;  %v2884_v59 = vld [vmem:[#allocation5 + $0x410] sm:$0xf0]  ;;  %v3031_v0 = vor.u32 %v3640_v46, %v3028_v47  ;;  %v2759_v5 = vor.u32 %v3572_v54, %v2756_v56  ;;  %v2714_v44 = vld [vmem:[#allocation5 + $0x2a8] sm:$0xf] }
  0x67   :  { %1440 = vmatpush.bf16.msra.mxu0 %v2695_v8  ;;  %v3668_v2 = vld [vmem:[#allocation5 + $0x604] sm:$0xf]  ;;  %v3140_v3 = vld [vmem:[#allocation5 + $0x610] sm:$0xf0]  ;;  %v2570_v46 = vld [vmem:[#allocation5 + $0x188] sm:$0xf] }
  0x68   :  { %1453 = vmatpush.bf16.msra.mxu1 %v2823_v9  ;;  %v3012_v8 = vld [vmem:[#allocation5 + $0x510] sm:$0xf0]  ;;  %v2887_v9 = vor.u32 %v3604_v58, %v2884_v59  ;;  %v3143_v16 = vor.u32 %v3668_v2, %v3140_v3  ;;  %v3527_v47 = vld [vmem:[#allocation5 + $0x194] sm:$0xf0]  ;;  %v2826_v51 = vld [vmem:[#allocation5 + $0x388] sm:$0xf] }
  0x69   :  { %1478 = vmatpush.bf16.msrb.mxu2 %v3095_v7  ;;  %v3636_v7 = vld [vmem:[#allocation5 + $0x504] sm:$0xf]  ;;  %v3591_v52 = vld [vmem:[#allocation5 + $0x394] sm:$0xf0]  ;;  %v2426_v54 = vld [vmem:[#allocation5 + $0x68] sm:$0xf]  ;;  %v2571_v56 = vor.u32 %v3527_v47, %v2570_v46 }
  0x6a   :  { %1466 = vmatpush.bf16.msra.mxu3 %v2951_v13  ;;  %v2474_v13 = vld [vmem:[#allocation5 + $0xc8] sm:$0xf]  ;;  %v3491_v58 = vld [vmem:[#allocation5 + $0x74] sm:$0xf0] }
  0x6b   :  { %1441 = vmatpush.bf16.msra.mxu0 %v2679_v20  ;;  %v2602_v20 = vld [vmem:[#allocation5 + $0x1c8] sm:$0xf]  ;;  %v2475_v23 = vor.u32 %v3503_v15, %v2474_v13  ;;  %v3559_v61 = vld [vmem:[#allocation5 + $0x294] sm:$0xf0]  ;;  %v2427_v1 = vor.u32 %v3491_v58, %v2426_v54 }
  0x6c   :  { %1454 = vmatpush.bf16.msra.mxu1 %v2807_v21  ;;  %v3535_v21 = vld [vmem:[#allocation5 + $0x1d4] sm:$0xf0]  ;;  %v2698_v59 = vld [vmem:[#allocation5 + $0x288] sm:$0xf] }
  0x6d   :  { %1479 = vmatpush.bf16.msrb.mxu2 %v3079_v19  ;;  %v3015_v19 = vor.u32 %v3636_v7, %v3012_v8  ;;  %v2603_v28 = vor.u32 %v3535_v21, %v2602_v20  ;;  %v2554_v62 = vld [vmem:[#allocation5 + $0x168] sm:$0xf]  ;;  %v3523_v63 = vld [vmem:[#allocation5 + $0x174] sm:$0xf0] }
  0x6e   :  { %1467 = vmatpush.bf16.msra.mxu3 %v2935_v25  ;;  %v3599_v25 = vld [vmem:[#allocation5 + $0x3d4] sm:$0xf0]  ;;  %v2810_v2 = vld [vmem:[#allocation5 + $0x368] sm:$0xf]  ;;  %v2555_v7 = vor.u32 %v3523_v63, %v2554_v62 }
  0x6f   :  { %1442 = vmatpush.bf16.msra.mxu0 %v2663_v33  ;;  %v3531_v33 = vld [vmem:[#allocation5 + $0x1b4] sm:$0xf0]  ;;  %v2538_v11 = vld [vmem:[#allocation5 + $0x148] sm:$0xf] }
  0x70   :  { %1455 = vmatpush.bf16.msra.mxu1 %v2791_v35  ;;  %v2859_v35 = vor.u32 %v3599_v25, %v2858_v24  ;;  %v2587_v42 = vor.u32 %v3531_v33, %v2586_v32  ;;  %v3587_v3 = vld [vmem:[#allocation5 + $0x374] sm:$0xf0]  ;;  %v2794_v15 = vld [vmem:[#allocation5 + $0x348] sm:$0xf] }
  0x71   :  { %1480 = vmatpush.bf16.msrb.mxu2 %v3063_v31  ;;  %v3567_v31 = vld [vmem:[#allocation5 + $0x2d4] sm:$0xf0]  ;;  %v2811_v13 = vor.u32 %v3587_v3, %v2810_v2  ;;  %v2394_v17 = vld [vmem:[#allocation5 + $0x28] sm:$0xf] }
  0x72   :  { %1468 = vmatpush.bf16.msra.mxu3 %v2919_v40  ;;  %v2442_v40 = vld [vmem:[#allocation5 + $0x88] sm:$0xf]  ;;  %v2731_v41 = vor.u32 %v3567_v31, %v2730_v30  ;;  %v3487_v8 = vld [vmem:[#allocation5 + $0x54] sm:$0xf0] }
  0x73   :  { %1443 = vmatpush.bf16.msra.mxu0 %v2647_v49  ;;  %v2843_v49 = vor.u32 %v3595_v38, %v2842_v37  ;;  %v3519_v12 = vld [vmem:[#allocation5 + $0x154] sm:$0xf0]  ;;  %v2666_v21 = vld [vmem:[#allocation5 + $0x248] sm:$0xf] }
  0x74   :  { %1456 = vmatpush.bf16.msra.mxu1 %v2775_v50  ;;  %v2443_v50 = vor.u32 %v3495_v43, %v2442_v40  ;;  %v3483_v20 = vld [vmem:[#allocation5 + $0x34] sm:$0xf0]  ;;  %v2778_v26 = vld [vmem:[#allocation5 + $0x328] sm:$0xf] }
  0x75   :  { %1481 = vmatpush.bf16.msrb.mxu2 %v3047_v45  ;;  %v3563_v45 = vld [vmem:[#allocation5 + $0x2b4] sm:$0xf0]  ;;  %v2378_v29 = vld [vmem:[#allocation5 + $0x8] sm:$0xf] }
  0x76   :  { %1469 = vmatpush.bf16.msra.mxu3 %v2903_v55  ;;  %v2715_v55 = vor.u32 %v3563_v45, %v2714_v44  ;;  %v3515_v24 = vld [vmem:[#allocation5 + $0x134] sm:$0xf0]  ;;  %v2506_v33 = vld [vmem:[#allocation5 + $0x108] sm:$0xf] }
  0x77   :  { %1444 = vmatpush.bf16.msra.mxu0 %v2631_v4  ;;  %v2410_v4 = vld [vmem:[#allocation5 + $0x48] sm:$0xf]  ;;  %v3479_v30 = vld [vmem:[#allocation5 + $0x14] sm:$0xf0] }
  0x78   :  { %1457 = vmatpush.bf16.msra.mxu1 %v2759_v5  ;;  %v2699_v5 = vor.u32 %v3559_v61, %v2698_v59  ;;  %v3511_v37 = vld [vmem:[#allocation5 + $0x114] sm:$0xf0]  ;;  %v3002_v38 = vld [vmem:[#allocation5 + $0x4e8] sm:$0xf]  ;;  %v2379_v45 = vor.u32 %v3479_v30, %v2378_v29  ;;  %v3493_v29 = vld [vmem:[#allocation5 + $0x8c] sm:$0xf] }
  0x79   :  { %1482 = vmatpush.bf16.msrb.mxu2 %v3031_v0  ;;  %v2827_v0 = vor.u32 %v3591_v52, %v2826_v51  ;;  %v3635_v40 = vld [vmem:[#allocation5 + $0x4f4] sm:$0xf0]  ;;  %v2762_v44 = vld [vmem:[#allocation5 + $0x308] sm:$0xf]  ;;  %v2507_v51 = vor.u32 %v3511_v37, %v2506_v33  ;;  %v3529_v33 = vld [vmem:[#allocation5 + $0x1ac] sm:$0xf] }
  0x7a   :  { %1470 = vmatpush.bf16.msra.mxu3 %v2887_v9  ;;  %1445 = vmatmul.bf16.vlgmr.msra.gmra.mxu0 %v3984_v53  ;;  %v2682_v9 = vld [vmem:[#allocation5 + $0x268] sm:$0xf]  ;;  %v3667_v43 = vld [vmem:[#allocation5 + $0x5f4] sm:$0xf0]  ;;  %v3003_v52 = vor.u32 %v3635_v40, %v3002_v38 }
  0x7b   :  { %1496 = vmatpush.bf16.msrb.mxu0 %v3143_v16  ;;  %1458 = vmatmul.bf16.vlgmr.msra.gmra.mxu1 %v3988_v60  ;;  %v3583_v16 = vld [vmem:[#allocation5 + $0x354] sm:$0xf0]  ;;  %v2986_v54 = vld [vmem:[#allocation5 + $0x4c8] sm:$0xf] }
  0x7c   :  { %1502 = vmatpush.bf16.msrb.mxu1 %v2491_v10  ;;  %v3555_v10 = vld [vmem:[#allocation5 + $0x274] sm:$0xf0]  ;;  %v2795_v25 = vor.u32 %v3583_v16, %v2794_v15  ;;  %v3146_v61 = vld [vmem:[#allocation5 + $0x608] sm:$0xf] }
  0x7d   :  { %1483 = vmatpush.bf16.msrb.mxu2 %v3015_v19  ;;  %1471 = vmatmul.bf16.vlgmr.msra.gmra.mxu3 %v4000_v34  ;;  %v2683_v18 = vor.u32 %v3555_v10, %v2682_v9  ;;  %v2539_v19 = vor.u32 %v3519_v12, %v2538_v11  ;;  %v3575_v46 = vld [vmem:[#allocation5 + $0x314] sm:$0xf0]  ;;  %v3537_v9 = vld [vmem:[#allocation5 + $0x1ec] sm:$0xf]  ;;  %v2620_v10 = vld [vmem:[#allocation5 + $0x1f8] sm:$0xf0] }
  0x7e   :  { %1515 = vmatpush.bf16.msrb.mxu3 %v2619_v14  ;;  %v2411_v14 = vor.u32 %v3487_v8, %v2410_v4  ;;  %v3631_v59 = vld [vmem:[#allocation5 + $0x4d4] sm:$0xf0]  ;;  %v2763_v63 = vor.u32 %v3575_v46, %v2762_v44  ;;  %v3501_v4 = vld [vmem:[#allocation5 + $0xcc] sm:$0xf]  ;;  %v2970_v12 = vld [vmem:[#allocation5 + $0x4a8] sm:$0xf] }
  0x7f   :  { %1528 = vmatpush.bf16.msra.mxu0 %v2747_v27  ;;  %v2395_v27 = vor.u32 %v3483_v20, %v2394_v17  ;;  %v3671_v62 = vld [vmem:[#allocation5 + $0x614] sm:$0xf0]  ;;  %v3497_v17 = vld [vmem:[#allocation5 + $0xac] sm:$0xf]  ;;  %v2460_v20 = vld [vmem:[#allocation5 + $0xb8] sm:$0xf0] }
  0x80   :  { %1503 = vmatpush.bf16.msrb.mxu1 %v2475_v23  ;;  %1484 = vmatmul.bf16.vlgmr.msrb.gmra.mxu2 %v4002_v39  ;;  %v2522_v23 = vld [vmem:[#allocation5 + $0x128] sm:$0xf]  ;;  %v3147_v8 = vor.u32 %v3671_v62, %v3146_v61  ;;  %v3659_v15 = vld [vmem:[#allocation5 + $0x5b4] sm:$0xf0]  ;;  %v2428_v46 = vld [vmem:[#allocation5 + $0x78] sm:$0xf0] }
  0x81   :  { %1541 = vmatpush.bf16.msra.mxu2 %v2875_v22  ;;  %v3551_v22 = vld [vmem:[#allocation5 + $0x254] sm:$0xf0]  ;;  %v2523_v32 = vor.u32 %v3515_v24, %v2522_v23  ;;  %v2954_v24 = vld [vmem:[#allocation5 + $0x488] sm:$0xf]  ;;  %v2412_v62 = vld [vmem:[#allocation5 + $0x58] sm:$0xf0] }
  0x82   :  { %1516 = vmatpush.bf16.msrb.mxu3 %v2603_v28  ;;  %v3579_v28 = vld [vmem:[#allocation5 + $0x334] sm:$0xf0]  ;;  %v2667_v31 = vor.u32 %v3551_v22, %v2666_v21  ;;  %v3533_v21 = vld [vmem:[#allocation5 + $0x1cc] sm:$0xf]  ;;  %v2604_v22 = vld [vmem:[#allocation5 + $0x1d8] sm:$0xf0] }
  0x83   :  { %1529 = vmatpush.bf16.msra.mxu0 %v2731_v41  ;;  %v2779_v41 = vor.u32 %v3579_v28, %v2778_v26  ;;  %v3082_v26 = vld [vmem:[#allocation5 + $0x588] sm:$0xf]  ;;  %v2463_v28 = vor.u32 %v3497_v17, %v2460_v20  ;;  %v2607_v30 = vor.u32 %v3533_v21, %v2604_v22  ;;  %v3619_v38 = vld [vmem:[#allocation5 + $0x474] sm:$0xf0]  ;;  %v2748_v20 = vld [vmem:[#allocation5 + $0x2f8] sm:$0xf0] }
  0x84   :  { %1504 = vmatpush.bf16.msrb.mxu1 %v2459_v36  ;;  %v3547_v36 = vld [vmem:[#allocation5 + $0x234] sm:$0xf0]  ;;  %v2938_v37 = vld [vmem:[#allocation5 + $0x468] sm:$0xf]  ;;  %v3601_v22 = vld [vmem:[#allocation5 + $0x3ec] sm:$0xf] }
  0x85   :  { %1542 = vmatpush.bf16.msra.mxu2 %v2859_v35  ;;  %v2650_v35 = vld [vmem:[#allocation5 + $0x228] sm:$0xf] }
  0x86   :  { %1517 = vmatpush.bf16.msrb.mxu3 %v2587_v42  ;;  %v3130_v42 = vld [vmem:[#allocation5 + $0x5e8] sm:$0xf]  ;;  %v2651_v47 = vor.u32 %v3547_v36, %v2650_v35  ;;  %v2588_v35 = vld [vmem:[#allocation5 + $0x1b8] sm:$0xf0] }
  0x87   :  { %1530 = vmatpush.bf16.msra.mxu0 %v2715_v55  ;;  %v2634_v55 = vld [vmem:[#allocation5 + $0x208] sm:$0xf]  ;;  %v3131_v58 = vor.u32 %v3667_v43, %v3130_v42  ;;  %v3489_v43 = vld [vmem:[#allocation5 + $0x6c] sm:$0xf]  ;;  %v2591_v44 = vor.u32 %v3529_v33, %v2588_v35  ;;  %v2732_v35 = vld [vmem:[#allocation5 + $0x2d8] sm:$0xf0] }
  0x88   :  { %1505 = vmatpush.bf16.msrb.mxu1 %v2443_v50  ;;  %v2492_v50 = vld [vmem:[#allocation5 + $0xf8] sm:$0xf0]  ;;  %v3066_v40 = vld [vmem:[#allocation5 + $0x568] sm:$0xf] }
  0x89   :  { %1543 = vmatpush.bf16.msra.mxu2 %v2843_v49  ;;  %v3505_v49 = vld [vmem:[#allocation5 + $0xec] sm:$0xf]  ;;  %v3018_v17 = vld [vmem:[#allocation5 + $0x508] sm:$0xf] }
  0x8a   :  { %1518 = vmatpush.bf16.msrb.mxu3 %v2571_v56  ;;  %3153 = vmatmul.msk.bf16.vlgmr.msrb.gmra.mxu0 %vm1316_vm0, %v3996_v48  ;;  %v3543_v56 = vld [vmem:[#allocation5 + $0x214] sm:$0xf0]  ;;  %v2495_v2 = vor.u32 %v3505_v49, %v2492_v50  ;;  %v2572_v49 = vld [vmem:[#allocation5 + $0x198] sm:$0xf0] }
  0x8b   :  { %1531 = vmatpush.bf16.msra.mxu0 %v2699_v5  ;;  %v2635_v3 = vor.u32 %v3543_v56, %v2634_v55  ;;  %v2987_v5 = vor.u32 %v3631_v59, %v2986_v54  ;;  %v3050_v54 = vld [vmem:[#allocation5 + $0x548] sm:$0xf]  ;;  %v3647_v55 = vld [vmem:[#allocation5 + $0x554] sm:$0xf0]  ;;  %v2431_v56 = vor.u32 %v3489_v43, %v2428_v46  ;;  %v3629_v43 = vld [vmem:[#allocation5 + $0x4cc] sm:$0xf] }
  0x8c   :  { %1506 = vmatpush.bf16.msrb.mxu1 %v2427_v1  ;;  %v3663_v1 = vld [vmem:[#allocation5 + $0x5d4] sm:$0xf0]  ;;  %v2988_v46 = vld [vmem:[#allocation5 + $0x4d8] sm:$0xf0] }
  0x8d   :  { %1544 = vmatpush.bf16.msra.mxu2 %v2827_v0  ;;  %v3114_v0 = vld [vmem:[#allocation5 + $0x5c8] sm:$0xf] }
  0x8e   :  { %1519 = vmatpush.bf16.msrb.mxu3 %v2555_v7  ;;  %v2476_v7 = vld [vmem:[#allocation5 + $0xd8] sm:$0xf0]  ;;  %v3115_v11 = vor.u32 %v3663_v1, %v3114_v0  ;;  %v3051_v1 = vor.u32 %v3647_v55, %v3050_v54 }
  0x8f   :  { %1532 = vmatpush.bf16.msra.mxu0 %v2683_v18  ;;  %v2479_v16 = vor.u32 %v3501_v4, %v2476_v7  ;;  %v2623_v18 = vor.u32 %v3537_v9, %v2620_v10  ;;  %v2556_v0 = vld [vmem:[#allocation5 + $0x178] sm:$0xf0]  ;;  %v3034_v4 = vld [vmem:[#allocation5 + $0x528] sm:$0xf] }
  0x90   :  { %1507 = vmatpush.bf16.msrb.mxu1 %v2411_v14  ;;  %v3098_v14 = vld [vmem:[#allocation5 + $0x5a8] sm:$0xf]  ;;  %v2508_v54 = vld [vmem:[#allocation5 + $0x118] sm:$0xf0] }
  0x91   :  { %1545 = vmatpush.bf16.msra.mxu2 %v2811_v13  ;;  %v3627_v13 = vld [vmem:[#allocation5 + $0x4b4] sm:$0xf0]  ;;  %v3099_v23 = vor.u32 %v3659_v15, %v3098_v14  ;;  %v2890_v15 = vld [vmem:[#allocation5 + $0x408] sm:$0xf]  ;;  %v2844_v55 = vld [vmem:[#allocation5 + $0x3b8] sm:$0xf0] }
  0x92   :  { %1520 = vmatpush.bf16.msrb.mxu3 %v2539_v19  ;;  %v2971_v19 = vor.u32 %v3627_v13, %v2970_v12  ;;  %v3517_v12 = vld [vmem:[#allocation5 + $0x14c] sm:$0xf]  ;;  %v2540_v13 = vld [vmem:[#allocation5 + $0x158] sm:$0xf0] }
  0x93   :  { %1533 = vmatpush.bf16.msra.mxu0 %v2667_v31 }
  0x94   :  { %1508 = vmatpush.bf16.msrb.mxu1 %v2395_v27  ;;  %v3655_v27 = vld [vmem:[#allocation5 + $0x594] sm:$0xf0] }
  0x95   :  { %1546 = vmatpush.bf16.msra.mxu2 %v2795_v25  ;;  %v3623_v25 = vld [vmem:[#allocation5 + $0x494] sm:$0xf0]  ;;  %v3083_v36 = vor.u32 %v3655_v27, %v3082_v26  ;;  %v3477_v26 = vld [vmem:[#allocation5 + $0xc] sm:$0xf]  ;;  %v2380_v27 = vld [vmem:[#allocation5 + $0x18] sm:$0xf0] }
  0x96   :  { %1521 = vmatpush.bf16.msrb.mxu3 %v2523_v32  ;;  %v2955_v31 = vor.u32 %v3623_v25, %v2954_v24  ;;  %v2444_v32 = vld [vmem:[#allocation5 + $0x98] sm:$0xf0]  ;;  %v2543_v24 = vor.u32 %v3517_v12, %v2540_v13  ;;  %v3621_v12 = vld [vmem:[#allocation5 + $0x48c] sm:$0xf] }
  0x97   :  { %1534 = vmatpush.bf16.msra.mxu0 %v2651_v47  ;;  %v2447_v42 = vor.u32 %v3493_v29, %v2444_v32  ;;  %v3525_v47 = vld [vmem:[#allocation5 + $0x18c] sm:$0xf]  ;;  %v2956_v13 = vld [vmem:[#allocation5 + $0x498] sm:$0xf0] }
  0x98   :  { %1509 = vmatpush.bf16.msrb.mxu1 %v2379_v45  ;;  %v2939_v45 = vor.u32 %v3619_v38, %v2938_v37  ;;  %v2575_v59 = vor.u32 %v3525_v47, %v2572_v49  ;;  %v3565_v32 = vld [vmem:[#allocation5 + $0x2cc] sm:$0xf]  ;;  %v2524_v37 = vld [vmem:[#allocation5 + $0x138] sm:$0xf0]  ;;  %v2383_v38 = vor.u32 %v3477_v26, %v2380_v27 }
  0x99   :  { %1547 = vmatpush.bf16.msra.mxu2 %v2779_v41  ;;  %v3651_v41 = vld [vmem:[#allocation5 + $0x574] sm:$0xf0]  ;;  %v3561_v47 = vld [vmem:[#allocation5 + $0x2ac] sm:$0xf]  ;;  %v2716_v49 = vld [vmem:[#allocation5 + $0x2b8] sm:$0xf0] }
  0x9a   :  { %1522 = vmatpush.bf16.msrb.mxu3 %v2507_v51  ;;  %v3067_v50 = vor.u32 %v3651_v41, %v3066_v40  ;;  %v2922_v51 = vld [vmem:[#allocation5 + $0x448] sm:$0xf]  ;;  %v3597_v40 = vld [vmem:[#allocation5 + $0x3cc] sm:$0xf]  ;;  %v2860_v41 = vld [vmem:[#allocation5 + $0x3d8] sm:$0xf0] }
  0x9b   :  { %1510 = vmatmul.bf16.vlgmr.msrb.gmra.mxu1 %v3986_v57  ;;  %1535 = vmatpush.bf16.msra.mxu0 %v2635_v3  ;;  %v3611_v3 = vld [vmem:[#allocation5 + $0x434] sm:$0xf0] }
  0x9c   :  { %1554 = vmatpush.bf16.msra.mxu1 %v3003_v52  ;;  %v3615_v52 = vld [vmem:[#allocation5 + $0x454] sm:$0xf0] }
  0x9d   :  { %1548 = vmatpush.bf16.msra.mxu2 %v2763_v63  ;;  %1523 = vmatmul.bf16.vlgmr.msrb.gmra.mxu3 %v3992_v6  ;;  %v2923_v61 = vor.u32 %v3615_v52, %v2922_v51  ;;  %v3521_v63 = vld [vmem:[#allocation5 + $0x16c] sm:$0xf] }
  0x9e   :  { %1567 = vmatpush.bf16.msra.mxu3 %v3131_v58  ;;  %1536 = vmatmul.bf16.vlgmr.msra.gmra.mxu0 %v3984_v53  ;;  %v3485_v58 = vld [vmem:[#allocation5 + $0x4c] sm:$0xf]  ;;  %v2559_v9 = vor.u32 %v3521_v63, %v2556_v0  ;;  %v2972_v0 = vld [vmem:[#allocation5 + $0x4b8] sm:$0xf0] }
  0x9f   :  { %1587 = vmatpush.bf16.msrb.mxu0 %v3147_v8  ;;  %v2415_v7 = vor.u32 %v3485_v58, %v2412_v62  ;;  %v3481_v8 = vld [vmem:[#allocation5 + $0x2c] sm:$0xf]  ;;  %v3132_v58 = vld [vmem:[#allocation5 + $0x5f8] sm:$0xf0] }
  0xa0   :  { %1555 = vmatpush.bf16.msra.mxu1 %v2987_v5  ;;  %1549 = vmatmul.bf16.vlgmr.msra.gmra.mxu2 %v3988_v60  ;;  %v3643_v5 = vld [vmem:[#allocation5 + $0x534] sm:$0xf0]  ;;  %v3593_v51 = vld [vmem:[#allocation5 + $0x3ac] sm:$0xf] }
  0xa1   :  { %1593 = vmatpush.bf16.msrb.mxu2 %v2495_v2  ;;  %v2906_v2 = vld [vmem:[#allocation5 + $0x428] sm:$0xf]  ;;  %v3035_v14 = vor.u32 %v3643_v5, %v3034_v4  ;;  %v3509_v52 = vld [vmem:[#allocation5 + $0x10c] sm:$0xf]  ;;  %v2700_v4 = vld [vmem:[#allocation5 + $0x298] sm:$0xf0] }
  0xa2   :  { %1568 = vmatpush.bf16.msra.mxu3 %v3115_v11  ;;  %v2907_v10 = vor.u32 %v3611_v3, %v2906_v2  ;;  %v2396_v11 = vld [vmem:[#allocation5 + $0x38] sm:$0xf0]  ;;  %v2511_v62 = vor.u32 %v3509_v52, %v2508_v54  ;;  %v3625_v63 = vld [vmem:[#allocation5 + $0x4ac] sm:$0xf]  ;;  %v4032_v54 = vld [vmem:[#allocation7] sm:$0xf] }
  0xa3   :  { %1606 = vmatpush.bf16.msra.mxu0 %v2623_v18  ;;  %v3639_v18 = vld [vmem:[#allocation5 + $0x514] sm:$0xf0]  ;;  %v2399_v21 = vor.u32 %v3481_v8, %v2396_v11  ;;  %v3557_v3 = vld [vmem:[#allocation5 + $0x28c] sm:$0xf] }
  0xa4   :  { %1556 = vmatpush.bf16.msra.mxu1 %v2971_v19  ;;  %v3569_v19 = vld [vmem:[#allocation5 + $0x2ec] sm:$0xf]  ;;  %v2703_v11 = vor.u32 %v3557_v3, %v2700_v4  ;;  %v3052_v4 = vld [vmem:[#allocation5 + $0x558] sm:$0xf0] }
  0xa5   :  { %1594 = vmatpush.bf16.msrb.mxu2 %v2479_v16  ;;  %v3607_v16 = vld [vmem:[#allocation5 + $0x414] sm:$0xf0]  ;;  %v2751_v29 = vor.u32 %v3569_v19, %v2748_v20  ;;  %v3589_v5 = vld [vmem:[#allocation5 + $0x38c] sm:$0xf]  ;;  %v2812_v19 = vld [vmem:[#allocation5 + $0x378] sm:$0xf0] }
  0xa6   :  { %1569 = vmatpush.bf16.msra.mxu3 %v3099_v23  ;;  %v2876_v23 = vld [vmem:[#allocation5 + $0x3f8] sm:$0xf0]  ;;  %v2891_v25 = vor.u32 %v3607_v16, %v2890_v15  ;;  %v3661_v8 = vld [vmem:[#allocation5 + $0x5cc] sm:$0xf] }
  0xa7   :  { %1607 = vmatpush.bf16.msra.mxu0 %v2607_v30  ;;  %v3633_v30 = vld [vmem:[#allocation5 + $0x4ec] sm:$0xf]  ;;  %v2879_v33 = vor.u32 %v3601_v22, %v2876_v23  ;;  %v2959_v22 = vor.u32 %v3621_v12, %v2956_v13 }
  0xa8   :  { %1557 = vmatpush.bf16.msra.mxu1 %v2955_v31  ;;  %v3004_v31 = vld [vmem:[#allocation5 + $0x4f8] sm:$0xf0]  ;;  %v3553_v16 = vld [vmem:[#allocation5 + $0x26c] sm:$0xf] }
  0xa9   :  { %1595 = vmatpush.bf16.msrb.mxu2 %v2463_v28  ;;  %v3019_v28 = vor.u32 %v3639_v18, %v3018_v17  ;;  %v3585_v17 = vld [vmem:[#allocation5 + $0x36c] sm:$0xf] }
  0xaa   :  { %1570 = vmatpush.bf16.msra.mxu3 %v3083_v36  ;;  %v3513_v36 = vld [vmem:[#allocation5 + $0x12c] sm:$0xf]  ;;  %v2815_v26 = vor.u32 %v3585_v17, %v2812_v19  ;;  %v3148_v19 = vld [vmem:[#allocation5 + $0x618] sm:$0xf0] }
  0xab   :  { %1608 = vmatpush.bf16.msra.mxu0 %v2591_v44  ;;  %v2735_v44 = vor.u32 %v3565_v32, %v2732_v35  ;;  %v3657_v20 = vld [vmem:[#allocation5 + $0x5ac] sm:$0xf]  ;;  %v2796_v32 = vld [vmem:[#allocation5 + $0x358] sm:$0xf0] }
  0xac   :  { %1558 = vmatpush.bf16.msra.mxu1 %v2939_v45  ;;  %v2527_v45 = vor.u32 %v3513_v36, %v2524_v37  ;;  %v3084_v35 = vld [vmem:[#allocation5 + $0x598] sm:$0xf0]  ;;  %v3645_v3 = vld [vmem:[#allocation5 + $0x54c] sm:$0xf] }
  0xad   :  { %1596 = vmatpush.bf16.msrb.mxu2 %v2447_v42  ;;  %v3007_v42 = vor.u32 %v3633_v30, %v3004_v31  ;;  %v3581_v30 = vld [vmem:[#allocation5 + $0x34c] sm:$0xf] }
  0xae   :  { %1571 = vmatpush.bf16.msra.mxu3 %v3067_v50  ;;  %3154 = vmatmul.msk.bf16.vlgmr.msrb.gmra.mxu0 %vm1316_vm0, %v3996_v48  ;;  %v2863_v50 = vor.u32 %v3597_v40, %v2860_v41  ;;  %v2924_v40 = vld [vmem:[#allocation5 + $0x458] sm:$0xf0]  ;;  %v3605_v13 = vld [vmem:[#allocation5 + $0x40c] sm:$0xf] }
  0xaf   :  { %1609 = vmatpush.bf16.msra.mxu0 %v2575_v59  ;;  %v2991_v59 = vor.u32 %v3629_v43, %v2988_v46  ;;  %v3577_v46 = vld [vmem:[#allocation5 + $0x32c] sm:$0xf] }
  0xb0   :  { %1559 = vmatpush.bf16.msra.mxu1 %v2923_v61  ;;  %v2719_v61 = vor.u32 %v3561_v47, %v2716_v49  ;;  %v2780_v47 = vld [vmem:[#allocation5 + $0x338] sm:$0xf0]  ;;  %v3649_v49 = vld [vmem:[#allocation5 + $0x56c] sm:$0xf] }
  0xb1   :  { %1597 = vmatpush.bf16.msrb.mxu2 %v2431_v56  ;;  %v3665_v56 = vld [vmem:[#allocation5 + $0x5ec] sm:$0xf] }
  0xb2   :  { %1572 = vmatpush.bf16.msra.mxu3 %v3051_v1  ;;  %v2847_v1 = vor.u32 %v3593_v51, %v2844_v55  ;;  %v3135_v2 = vor.u32 %v3665_v56, %v3132_v58  ;;  %v3609_v56 = vld [vmem:[#allocation5 + $0x42c] sm:$0xf]  ;;  %v2908_v58 = vld [vmem:[#allocation5 + $0x438] sm:$0xf0] }
  0xb3   :  { %1610 = vmatpush.bf16.msra.mxu0 %v2559_v9  ;;  %v3116_v9 = vld [vmem:[#allocation5 + $0x5d8] sm:$0xf0]  ;;  %v3669_v17 = vld [vmem:[#allocation5 + $0x60c] sm:$0xf] }
  0xb4   :  { %1560 = vmatpush.bf16.msra.mxu1 %v2907_v10  ;;  %v2975_v10 = vor.u32 %v3625_v63, %v2972_v0  ;;  %v3119_v15 = vor.u32 %v3661_v8, %v3116_v9  ;;  %v2636_v63 = vld [vmem:[#allocation5 + $0x218] sm:$0xf0]  ;;  %v3573_v0 = vld [vmem:[#allocation5 + $0x30c] sm:$0xf]  ;;  %v3278_v9 = vld [vmem:[#allocation8 + $0xf0] sm:$0xf] }
  0xb5   :  { %1598 = vmatpush.bf16.msrb.mxu2 %v2415_v7  ;;  %v2828_v7 = vld [vmem:[#allocation5 + $0x398] sm:$0xf0] }
  0xb6   :  { %1573 = vmatpush.bf16.msra.mxu3 %v3035_v14  ;;  %v2831_v14 = vor.u32 %v3589_v5, %v2828_v7  ;;  %v4023_v18 = vpop.f32.mrf.mxu0  ;;  %v2911_v7 = vor.u32 %v3609_v56, %v2908_v58  ;;  %v3687_v8 = vld [vmem:[#allocation8 + $0x74] sm:$0xf0]  ;;  %v3182_v58 = vld [vmem:[#allocation8 + $0x30] sm:$0xf] }
  0xb7   :  { %1611 = vmatpush.bf16.msra.mxu0 %v2543_v24  ;;  %v3617_v24 = vld [vmem:[#allocation5 + $0x46c] sm:$0xf]  ;;  %v4026_v31 = vpop.f32.mrf.mxu1 }
  0xb8   :  { %1561 = vmatpush.bf16.msra.mxu1 %v2891_v25  ;;  %v2940_v25 = vld [vmem:[#allocation5 + $0x478] sm:$0xf0] }
  0xb9   :  { %1599 = vmatpush.bf16.msrb.mxu2 %v2399_v21  ;;  %v3100_v21 = vld [vmem:[#allocation5 + $0x5b8] sm:$0xf0]  ;;  %v2943_v36 = vor.u32 %v3617_v24, %v2940_v25 }
  0xba   :  { %1574 = vmatpush.bf16.msra.mxu3 %v3019_v28  ;;  %v3103_v27 = vor.u32 %v3657_v20, %v3100_v21  ;;  %v3549_v28 = vld [vmem:[#allocation5 + $0x24c] sm:$0xf] }
  0xbb   :  { %1562 = vmatmul.bf16.vlgmr.msra.gmra.mxu1 %v4000_v34  ;;  %1612 = vmatpush.bf16.msra.mxu0 %v2527_v45  ;;  %v2652_v45 = vld [vmem:[#allocation5 + $0x238] sm:$0xf0] }
  0xbc   :  { %1619 = vmatpush.bf16.msrb.mxu1 %v2751_v29  ;;  %v2668_v29 = vld [vmem:[#allocation5 + $0x258] sm:$0xf0] }
  0xbd   :  { %1600 = vmatpush.bf16.msrb.mxu2 %v2383_v38  ;;  %1575 = vmatmul.bf16.vlgmr.msra.gmra.mxu3 %v4002_v39  ;;  %v2671_v37 = vor.u32 %v3549_v28, %v2668_v29  ;;  %v3613_v38 = vld [vmem:[#allocation5 + $0x44c] sm:$0xf]  ;;  %v3151_v28 = vor.u32 %v3669_v17, %v3148_v19  ;;  %v3270_v29 = vld [vmem:[#allocation8 + $0xe0] sm:$0xf] }
  0xbe   :  { %1632 = vmatpush.bf16.msrb.mxu3 %v2879_v33  ;;  %v3653_v33 = vld [vmem:[#allocation5 + $0x58c] sm:$0xf]  ;;  %v1331_v51 = vpop.f32.mrf.mxu0  ;;  %v2927_v52 = vor.u32 %v3613_v38, %v2924_v40  ;;  %v3198_v38 = vld [vmem:[#allocation8 + $0x50] sm:$0xf]  ;;  %v3683_v40 = vld [vmem:[#allocation8 + $0x54] sm:$0xf0] }
  0xbf   :  { %1613 = vmatpush.bf16.msra.mxu0 %v2511_v62  ;;  %v3087_v43 = vor.u32 %v3653_v33, %v3084_v35  ;;  %v1344_v5 = vpop.f32.mrf.mxu1  ;;  %v3254_v51 = vld [vmem:[#allocation8 + $0xc0] sm:$0xf] }
  0xc0   :  { %1620 = vmatpush.bf16.msrb.mxu1 %v2735_v44  ;;  %1601 = vmatmul.bf16.vlgmr.msrb.gmra.mxu2 %v3986_v57  ;;  %v2684_v57 = vld [vmem:[#allocation5 + $0x278] sm:$0xf0]  ;;  %v4030_v41 = vpop.f32.mrf.mxu3  ;;  %v3545_v44 = vld [vmem:[#allocation5 + $0x22c] sm:$0xf]  ;;  %v3238_v5 = vld [vmem:[#allocation8 + $0xa0] sm:$0xf] }
  0xc1   :  { %1645 = vmatpush.bf16.msra.mxu2 %v3007_v42  ;;  %v2687_v23 = vor.u32 %v3553_v16, %v2684_v57  ;;  %v2799_v42 = vor.u32 %v3581_v30, %v2796_v32  ;;  %v2655_v55 = vor.u32 %v3545_v44, %v2652_v45  ;;  %v3055_v57 = vor.u32 %v3645_v3, %v3052_v4  ;;  %v3701_v30 = vld [vmem:[#allocation8 + $0xe4] sm:$0xf0]  ;;  %v3262_v44 = vld [vmem:[#allocation8 + $0xd0] sm:$0xf]  ;;  %v3158_v19 = vld [vmem:[#allocation8] sm:$0xf] }
  0xc2   :  { %1633 = vmatpush.bf16.msrb.mxu3 %v2863_v50  ;;  %1614 = vmatmul.bf16.vlgmr.msra.gmra.mxu0 %v3992_v6  ;;  %v4028_v6 = vpop.f32.mrf.mxu2  ;;  %v3068_v50 = vld [vmem:[#allocation5 + $0x578] sm:$0xf0]  ;;  %v3677_v3 = vld [vmem:[#allocation8 + $0x24] sm:$0xf0] }
  0xc3   :  { %1658 = vmatpush.bf16.msrb.mxu0 %v3135_v2  ;;  %v3071_v62 = vor.u32 %v3649_v49, %v3068_v50  ;;  %v3214_v2 = vld [vmem:[#allocation8 + $0x70] sm:$0xf]  ;;  %v3190_v49 = vld [vmem:[#allocation8 + $0x40] sm:$0xf] }
  0xc4   :  { %1621 = vmatpush.bf16.msrb.mxu1 %v2719_v61  ;;  %v2783_v61 = vor.u32 %v3577_v46, %v2780_v47  ;;  %v3215_v21 = vor.u32 %v3687_v8, %v3214_v2  ;;  %v3199_v47 = vor.u32 %v3683_v40, %v3198_v38  ;;  %v3700_v38 = vld [vmem:[#allocation8 + $0xe4] sm:$0xf]  ;;  %v3272_v40 = vld [vmem:[#allocation8 + $0xe8] sm:$0xf0] }
  0xc5   :  { %1646 = vmatpush.bf16.msra.mxu2 %v2991_v59  ;;  %v3541_v59 = vld [vmem:[#allocation5 + $0x20c] sm:$0xf] }
  0xc6   :  { %1634 = vmatpush.bf16.msrb.mxu3 %v2847_v1  ;;  %v2764_v1 = vld [vmem:[#allocation5 + $0x318] sm:$0xf0]  ;;  %v2639_v12 = vor.u32 %v3541_v59, %v2636_v63 }
  0xc7   :  { %1659 = vmatpush.bf16.msrb.mxu0 %v3119_v15  ;;  %v304_v15 = vperm.slane %v4032_v54, 0  ;;  %v2767_v16 = vor.u32 %v3573_v0, %v2764_v1  ;;  %v3695_v63 = vld [vmem:[#allocation8 + $0xb4] sm:$0xf0] }
  0xc8   :  { %1622 = vmatpush.bf16.msrb.mxu1 %v2703_v11  ;;  %v1370_v20 = vpop.f32.mrf.mxu3 }
  0xc9   :  { %1647 = vmatpush.bf16.msra.mxu2 %v2975_v10  ;;  %v3703_v10 = vld [vmem:[#allocation8 + $0xf4] sm:$0xf0]  ;;  %v1330_v32 = vadd.f32 %v4023_v18, %v304_v15  ;;  %v3673_v20 = vld [vmem:[#allocation8 + $0x4] sm:$0xf0] }
  0xca   :  { %1635 = vmatpush.bf16.msrb.mxu3 %v2831_v14  ;;  %v1357_v11 = vpop.f32.mrf.mxu2  ;;  %v2892_v14 = vld [vmem:[#allocation5 + $0x418] sm:$0xf0]  ;;  %v3279_v24 = vor.u32 %v3703_v10, %v3278_v9  ;;  %v3166_v10 = vld [vmem:[#allocation8 + $0x10] sm:$0xf] }
  0xcb   :  { %1660 = vmatpush.bf16.msrb.mxu0 %v3103_v27  ;;  %v2895_v25 = vor.u32 %v3605_v13, %v2892_v14  ;;  %v3685_v27 = vld [vmem:[#allocation8 + $0x64] sm:$0xf0]  ;;  %v3699_v18 = vld [vmem:[#allocation8 + $0xd4] sm:$0xf0]  ;;  %v1343_v45 = vadd.f32 %v4026_v31, %v1330_v32 }
  0xcc   :  { %1623 = vmatpush.bf16.msrb.mxu1 %v2687_v23  ;;  %v3036_v23 = vld [vmem:[#allocation5 + $0x538] sm:$0xf0]  ;;  %v3263_v50 = vor.u32 %v3699_v18, %v3262_v44  ;;  %v3682_v18 = vld [vmem:[#allocation8 + $0x54] sm:$0xf] }
  0xcd   :  { %1648 = vmatpush.bf16.msra.mxu2 %v2959_v22  ;;  %v3641_v22 = vld [vmem:[#allocation5 + $0x52c] sm:$0xf]  ;;  %v3679_v31 = vld [vmem:[#allocation8 + $0x34] sm:$0xf0] }
  0xce   :  { %1636 = vmatpush.bf16.msrb.mxu3 %v2815_v26  ;;  %v3206_v26 = vld [vmem:[#allocation8 + $0x60] sm:$0xf]  ;;  %v3039_v33 = vor.u32 %v3641_v22, %v3036_v23  ;;  %v3183_v1 = vor.u32 %v3679_v31, %v3182_v58  ;;  %v3675_v11 = vld [vmem:[#allocation8 + $0x14] sm:$0xf0]  ;;  %v3216_v23 = vld [vmem:[#allocation8 + $0x78] sm:$0xf0] }
  0xcf   :  { %1661 = vmatpush.bf16.msrb.mxu0 %v3087_v43  ;;  %v3207_v35 = vor.u32 %v3685_v27, %v3206_v26  ;;  %v3691_v15 = vld [vmem:[#allocation8 + $0x94] sm:$0xf0]  ;;  %v3702_v26 = vld [vmem:[#allocation8 + $0xf4] sm:$0xf]  ;;  %v3280_v27 = vld [vmem:[#allocation8 + $0xf8] sm:$0xf0] }
  0xd0   :  { %1624 = vmatpush.bf16.msrb.mxu1 %v2671_v37  ;;  %v3020_v37 = vld [vmem:[#allocation5 + $0x518] sm:$0xf0]  ;;  %v3680_v58 = vld [vmem:[#allocation8 + $0x44] sm:$0xf]  ;;  %v3192_v31 = vld [vmem:[#allocation8 + $0x48] sm:$0xf0] }
  0xd1   :  { %1649 = vmatpush.bf16.msra.mxu2 %v2943_v36  ;;  %v3637_v36 = vld [vmem:[#allocation5 + $0x50c] sm:$0xf] }
  0xd2   :  { %1637 = vmatpush.bf16.msrb.mxu3 %v2799_v42  ;;  %v3271_v42 = vor.u32 %v3701_v30, %v3270_v29  ;;  %v1407_v43 = vpop.f32.mrf.mxu2  ;;  %v3023_v46 = vor.u32 %v3637_v36, %v3020_v37  ;;  %v3283_v36 = vor.u32 %v3702_v26, %v3280_v27  ;;  %v3232_v26 = vld [vmem:[#allocation8 + $0x98] sm:$0xf0] }
  0xd3   :  { %1662 = vmatpush.bf16.msrb.mxu0 %v3071_v62  ;;  %v3246_v62 = vld [vmem:[#allocation8 + $0xb0] sm:$0xf] }
  0xd4   :  { %1625 = vmatpush.bf16.msrb.mxu1 %v2655_v55  ;;  %v3247_v4 = vor.u32 %v3695_v63, %v3246_v62  ;;  %v3256_v62 = vld [vmem:[#allocation8 + $0xc8] sm:$0xf0]  ;;  %v3326_v63 = vld [vmem:[#allocation8 + $0x150] sm:$0xf] }
  0xd5   :  { %1650 = vmatpush.bf16.msra.mxu2 %v2927_v52  ;;  %v3697_v52 = vld [vmem:[#allocation8 + $0xc4] sm:$0xf0] }
  0xd6   :  { %1638 = vmatpush.bf16.msrb.mxu3 %v2783_v61  ;;  %v3255_v59 = vor.u32 %v3697_v52, %v3254_v51 }
  0xd7   :  { %1663 = vmatpush.bf16.msrb.mxu0 %v3055_v57  ;;  %v1381_v56 = vpop.f32.mrf.mxu0  ;;  %v3167_v57 = vor.u32 %v3675_v11, %v3166_v10 }
  0xd8   :  { %1626 = vmatpush.bf16.msrb.mxu1 %v2639_v12  ;;  %v1394_v61 = vpop.f32.mrf.mxu1 }
  0xd9   :  { %1651 = vmatpush.bf16.msra.mxu2 %v2911_v7  ;;  %v3693_v7 = vld [vmem:[#allocation8 + $0xa4] sm:$0xf0] }
  0xda   :  { %1639 = vmatpush.bf16.msrb.mxu3 %v2767_v16  ;;  %v3239_v13 = vor.u32 %v3693_v7, %v3238_v5 }
  0xdb   :  { %1627 = vmatmul.bf16.vlgmr.msrb.gmra.mxu1 %v3984_v53  ;;  %1664 = vmatpush.bf16.msrb.mxu0 %v3039_v33  ;;  %v3681_v53 = vld [vmem:[#allocation8 + $0x44] sm:$0xf0] }
  0xdc   :  { %2095 = vmatpush.bf16.msra.mxu1 %v3279_v24  ;;  %v3191_v55 = vor.u32 %v3681_v53, %v3190_v49  ;;  %v3222_v24 = vld [vmem:[#allocation8 + $0x80] sm:$0xf]  ;;  %v3698_v49 = vld [vmem:[#allocation8 + $0xd4] sm:$0xf]  ;;  %v3264_v53 = vld [vmem:[#allocation8 + $0xd8] sm:$0xf0] }
  0xdd   :  { %1652 = vmatpush.bf16.msra.mxu2 %v2895_v25  ;;  %1640 = vmatmul.bf16.vlgmr.msrb.gmra.mxu3 %v3988_v60  ;;  %v1356_v60 = vadd.f32 %v4028_v6, %v1343_v45  ;;  %v3174_v6 = vld [vmem:[#allocation8 + $0x20] sm:$0xf]  ;;  %v3689_v25 = vld [vmem:[#allocation8 + $0x84] sm:$0xf0]  ;;  %v3200_v45 = vld [vmem:[#allocation8 + $0x58] sm:$0xf0] }
  0xde   :  { %2082 = vmatpush.bf16.msra.mxu3 %v3215_v21  ;;  %v3175_v8 = vor.u32 %v3677_v3, %v3174_v6  ;;  %v3686_v21 = vld [vmem:[#allocation8 + $0x74] sm:$0xf]  ;;  %v3223_v33 = vor.u32 %v3689_v25, %v3222_v24  ;;  %v3184_v3 = vld [vmem:[#allocation8 + $0x38] sm:$0xf0]  ;;  %v3713_v24 = vld [vmem:[#allocation8 + $0x144] sm:$0xf0] }
  0xdf   :  { %1665 = vmatpush.bf16.msrb.mxu0 %v3023_v46  ;;  %v1369_v0 = vadd.f32 %v4030_v41, %v1356_v60  ;;  %v3230_v41 = vld [vmem:[#allocation8 + $0x90] sm:$0xf]  ;;  %v3219_v30 = vor.u32 %v3686_v21, %v3216_v23  ;;  %v3275_v46 = vor.u32 %v3700_v38, %v3272_v40  ;;  %v3334_v60 = vld [vmem:[#allocation8 + $0x160] sm:$0xf]  ;;  %v3678_v6 = vld [vmem:[#allocation8 + $0x34] sm:$0xf] }
  0xe0   :  { %1653 = vmatmul.bf16.vlgmr.msra.gmra.mxu2 %v4000_v34  ;;  %2096 = vmatpush.bf16.msra.mxu1 %v3271_v42  ;;  %v1409_v34 = vpop.f32.mrf.mxu2  ;;  %v1420_v12 = vpop.f32.mrf.mxu3  ;;  %v3231_v22 = vor.u32 %v3691_v15, %v3230_v41  ;;  %v305_v42 = vperm.slane %v4032_v54, 1  ;;  %v3187_v11 = vor.u32 %v3678_v6, %v3184_v3  ;;  %v3692_v41 = vld [vmem:[#allocation8 + $0xa4] sm:$0xf]  ;;  %v3240_v15 = vld [vmem:[#allocation8 + $0xa8] sm:$0xf0] }
  0xe1   :  { %1678 = vmatpush.bf16.msrb.mxu2 %v3151_v28  ;;  %v1382_v2 = vadd.f32 %v1381_v56, %v1369_v0  ;;  %v1396_v14 = vpop.f32.mrf.mxu1  ;;  %v3159_v28 = vor.u32 %v3673_v20, %v3158_v19  ;;  %v3203_v56 = vor.u32 %v3682_v18, %v3200_v45  ;;  %v3715_v0 = vld [vmem:[#allocation8 + $0x154] sm:$0xf0]  ;;  %v3168_v19 = vld [vmem:[#allocation8 + $0x18] sm:$0xf0]  ;;  %v3243_v21 = vor.u32 %v3692_v41, %v3240_v15  ;;  %v3318_v23 = vld [vmem:[#allocation8 + $0x140] sm:$0xf] }
  0xe2   :  { %2083 = vmatpush.bf16.msra.mxu3 %v3207_v35  ;;  %1666 = vmatmul.bf16.vlgmr.msrb.gmra.mxu0 %v4002_v39  ;;  %v1383_v39 = vpop.f32.mrf.mxu0  ;;  %v3208_v35 = vld [vmem:[#allocation8 + $0x68] sm:$0xf0]  ;;  %v1421_v51 = vadd.f32 %v1420_v12, %v305_v42  ;;  %v3327_v5 = vor.u32 %v3715_v0, %v3326_v63  ;;  %v3319_v27 = vor.u32 %v3713_v24, %v3318_v23  ;;  %v3302_v38 = vld [vmem:[#allocation8 + $0x120] sm:$0xf]  ;;  %v3709_v40 = vld [vmem:[#allocation8 + $0x124] sm:$0xf0] }
  0xe3   :  { %v1395_v9 = vadd.f32 %v1394_v61, %v1382_v2  ;;  %v3696_v61 = vld [vmem:[#allocation8 + $0xc4] sm:$0xf]  ;;  %v3195_v2 = vor.u32 %v3680_v58, %v3192_v31  ;;  %v3176_v12 = vld [vmem:[#allocation8 + $0x28] sm:$0xf0]  ;;  %v3286_v31 = vld [vmem:[#allocation8 + $0x100] sm:$0xf] }
  0xe4   :  { %2097 = vmatpush.bf16.msra.mxu1 %v3263_v50  ;;  %v3719_v50 = vld [vmem:[#allocation8 + $0x174] sm:$0xf0]  ;;  %v3676_v39 = vld [vmem:[#allocation8 + $0x24] sm:$0xf]  ;;  %v3224_v18 = vld [vmem:[#allocation8 + $0x88] sm:$0xf0] }
  0xe5   :  { %v1408_v17 = vadd.f32 %v1407_v43, %v1395_v9  ;;  %v3248_v9 = vld [vmem:[#allocation8 + $0xb8] sm:$0xf0]  ;;  %v3718_v63 = vld [vmem:[#allocation8 + $0x174] sm:$0xf]  ;;  %v3336_v6 = vld [vmem:[#allocation8 + $0x168] sm:$0xf0] }
  0xe6   :  { %2084 = vmatpush.bf16.msra.mxu3 %v3199_v47  ;;  %v3342_v47 = vld [vmem:[#allocation8 + $0x170] sm:$0xf]  ;;  %v3344_v0 = vld [vmem:[#allocation8 + $0x178] sm:$0xf0]  ;;  %v3733_v24 = vld [vmem:[#allocation8 + $0x1e4] sm:$0xf0] }
  0xe7   :  { %v1684_v29 = vmax.f32 %v1408_v17, 0.0  ;;  %v3343_v52 = vor.u32 %v3719_v50, %v3342_v47  ;;  %v3674_v17 = vld [vmem:[#allocation8 + $0x14] sm:$0xf]  ;;  %v3303_v47 = vor.u32 %v3709_v40, %v3302_v38  ;;  %v3294_v50 = vld [vmem:[#allocation8 + $0x110] sm:$0xf] }
  0xe8   :  { %2098 = vmatpush.bf16.msra.mxu1 %v3255_v59  ;;  %v1433_v16 = vpop.f32.mrf.mxu2  ;;  %v1422_v32 = vpop.f32.mrf.mxu3  ;;  %v3267_v59 = vor.u32 %v3698_v49, %v3264_v53  ;;  %v3312_v41 = vld [vmem:[#allocation8 + $0x138] sm:$0xf0] }
  0xe9   :  { %v4046_v43 = vpack.c.bf16 %v1684_v29, %v1684_v29  ;;  %2108 = vmatpush.bf16.msra.mxu2 %v3343_v52  ;;  %v3711_v29 = vld [vmem:[#allocation8 + $0x134] sm:$0xf0] }
  0xea   :  { %2085 = vmatpush.bf16.msra.mxu3 %v3191_v55  ;;  %v3717_v55 = vld [vmem:[#allocation8 + $0x164] sm:$0xf0] }
  0xeb   :  { %v3335_v34 = vor.u32 %v3717_v55, %v3334_v60 }
  0xec   :  { %2099 = vmatpush.bf16.msra.mxu1 %v3247_v4  ;;  %v3259_v4 = vor.u32 %v3696_v61, %v3256_v62 }
  0xed   :  { %2109 = vmatpush.bf16.msra.mxu2 %v3335_v34 }
  0xee   :  { %2086 = vmatpush.bf16.msra.mxu3 %v3183_v1  ;;  %v1434_v1 = vadd.f32 %v1433_v16, %v1421_v51  ;;  %v3707_v51 = vld [vmem:[#allocation8 + $0x114] sm:$0xf0] }
  0xf0   :  { %3155 = vmatmul.msk.bf16.vlgmr.msrb.gmra.mxu2 %vm1316_vm0, %v3996_v48  ;;  %2100 = vmatpush.bf16.msra.mxu1 %v3239_v13  ;;  %v3684_v48 = vld [vmem:[#allocation8 + $0x64] sm:$0xf]  ;;  %v1435_v37 = vpop.f32.mrf.mxu2 }
  0xf1   :  { %v3211_v44 = vor.u32 %v3684_v48, %v3208_v35  ;;  %2110 = vmatpush.bf16.msra.mxu2 %v3327_v5  ;;  %v3672_v48 = vld [vmem:[#allocation8 + $0x4] sm:$0xf]  ;;  %v3714_v5 = vld [vmem:[#allocation8 + $0x154] sm:$0xf] }
  0xf2   :  { %2087 = vmatpush.bf16.msra.mxu3 %v3175_v8  ;;  %v3694_v8 = vld [vmem:[#allocation8 + $0xb4] sm:$0xf] }
  0xf3   :  { %v3251_v13 = vor.u32 %v3694_v8, %v3248_v9 }
  0xf4   :  { %2101 = vmatpush.bf16.msra.mxu1 %v3231_v22  ;;  %v3690_v22 = vld [vmem:[#allocation8 + $0x94] sm:$0xf] }
  0xf5   :  { %2111 = vmatpush.bf16.msra.mxu2 %v3319_v27  ;;  %v3235_v37 = vor.u32 %v3690_v22, %v3232_v26  ;;  %v3398_v22 = vld [vmem:[#allocation8 + $0x1e0] sm:$0xf]  ;;  %v3706_v26 = vld [vmem:[#allocation8 + $0x114] sm:$0xf]  ;;  %v3296_v27 = vld [vmem:[#allocation8 + $0x118] sm:$0xf0] }
  0xf6   :  { %2088 = vmatpush.bf16.msra.mxu3 %v3167_v57  ;;  %v3179_v57 = vor.u32 %v3676_v39, %v3176_v12 }
  0xf7   :  { %v1446_v7 = vpop.f32.mrf.mxu0 }
  0xf8   :  { %2102 = vmatpush.bf16.msra.mxu1 %v3223_v33  ;;  %v1447_v10 = vadd.f32 %v1446_v7, %v1434_v1  ;;  %v1459_v14 = vpop.f32.mrf.mxu1  ;;  %v3171_v33 = vor.u32 %v3674_v17, %v3168_v19  ;;  %v3347_v1 = vor.u32 %v3718_v63, %v3344_v0  ;;  %v3328_v7 = vld [vmem:[#allocation8 + $0x158] sm:$0xf0]  ;;  %v3735_v17 = vld [vmem:[#allocation8 + $0x1f4] sm:$0xf0] }
  0xf9   :  { %v3331_v9 = vor.u32 %v3714_v5, %v3328_v7 }
  0xfa   :  { %2089 = vmatpush.bf16.msra.mxu3 %v3159_v28  ;;  %v1460_v16 = vadd.f32 %v1459_v14, %v1447_v10  ;;  %v3310_v28 = vld [vmem:[#allocation8 + $0x130] sm:$0xf]  ;;  %v3320_v10 = vld [vmem:[#allocation8 + $0x148] sm:$0xf0]  ;;  %v3710_v14 = vld [vmem:[#allocation8 + $0x134] sm:$0xf] }
  0xfb   :  { %v3311_v35 = vor.u32 %v3711_v29, %v3310_v28  ;;  %v3390_v28 = vld [vmem:[#allocation8 + $0x1d0] sm:$0xf]  ;;  %v3731_v29 = vld [vmem:[#allocation8 + $0x1d4] sm:$0xf0] }
  0xfc   :  { %2147 = vmatpush.bf16.msrb.mxu1 %v3283_v36  ;;  %v3160_v36 = vld [vmem:[#allocation8 + $0x8] sm:$0xf0] }
  0xfd   :  { %2090 = vmatmul.bf16.vlgmr.msra.gmra.mxu3 %v4046_v43  ;;  %2112 = vmatpush.bf16.msra.mxu2 %v3311_v35  ;;  %v3391_v35 = vor.u32 %v3731_v29, %v3390_v28  ;;  %v3722_v29 = vld [vmem:[#allocation8 + $0x194] sm:$0xf] }
  0xfe   :  { %2134 = vmatpush.bf16.msrb.mxu3 %v3219_v30 }
  0xff   :  { %v1448_v25 = vpop.f32.mrf.mxu0 }
 0x100   :  { %2148 = vmatpush.bf16.msrb.mxu1 %v3275_v46  ;;  %v1472_v20 = vpop.f32.mrf.mxu3  ;;  %v1461_v42 = vpop.f32.mrf.mxu1  ;;  %v3163_v46 = vor.u32 %v3672_v48, %v3160_v36  ;;  %v3399_v25 = vor.u32 %v3733_v24, %v3398_v22  ;;  %v3299_v48 = vor.u32 %v3706_v26, %v3296_v27  ;;  %v3704_v36 = vld [vmem:[#allocation8 + $0x104] sm:$0xf]  ;;  %v3376_v22 = vld [vmem:[#allocation8 + $0x1b8] sm:$0xf0]  ;;  %v3368_v26 = vld [vmem:[#allocation8 + $0x1a8] sm:$0xf0] }
 0x101   :  { %v1473_v30 = vadd.f32 %v1472_v20, %v1460_v16  ;;  %2113 = vmatpush.bf16.msra.mxu2 %v3303_v47  ;;  %v3315_v16 = vor.u32 %v3710_v14, %v3312_v41  ;;  %v3708_v20 = vld [vmem:[#allocation8 + $0x124] sm:$0xf]  ;;  %v307_v27 = vperm.slane %v4032_v54, 3 }
 0x102   :  { %2135 = vmatpush.bf16.msrb.mxu3 %v3211_v44  ;;  %v3688_v44 = vld [vmem:[#allocation8 + $0x84] sm:$0xf] }
 0x103   :  { %v1485_v32 = vpop.f32.mrf.mxu2  ;;  %v3227_v49 = vor.u32 %v3688_v44, %v3224_v18  ;;  %v3382_v44 = vld [vmem:[#allocation8 + $0x1c0] sm:$0xf]  ;;  %v3729_v18 = vld [vmem:[#allocation8 + $0x1c4] sm:$0xf0] }
 0x104   :  { %2149 = vmatpush.bf16.msrb.mxu1 %v3267_v59  ;;  %v1486_v45 = vadd.f32 %v1485_v32, %v1473_v30  ;;  %v3705_v59 = vld [vmem:[#allocation8 + $0x104] sm:$0xf0]  ;;  %v306_v30 = vperm.slane %v4032_v54, 2 }
 0x105   :  { %v3287_v34 = vor.u32 %v3705_v59, %v3286_v31 }
 0x106   :  { %2136 = vmatpush.bf16.msrb.mxu3 %v3203_v56  ;;  %v3295_v56 = vor.u32 %v3707_v51, %v3294_v50 }
 0x107   :  { %v1498_v52 = vpop.f32.mrf.mxu0 }
 0x108   :  { %2150 = vmatpush.bf16.msrb.mxu1 %v3259_v4  ;;  %v1474_v53 = vpop.f32.mrf.mxu3  ;;  %v1499_v60 = vadd.f32 %v1498_v52, %v1486_v45  ;;  %2114 = vmatpush.bf16.msra.mxu2 %v3295_v56 }
 0x109   :  { %v3727_v53 = vld [vmem:[#allocation8 + $0x1b4] sm:$0xf0] }
 0x10a   :  { %2137 = vmatpush.bf16.msrb.mxu3 %v3195_v2  ;;  %v1685_v58 = vmax.f32 %v1499_v60, 0.0  ;;  %v3716_v2 = vld [vmem:[#allocation8 + $0x164] sm:$0xf]  ;;  %v3366_v60 = vld [vmem:[#allocation8 + $0x1a0] sm:$0xf] }
 0x10b   :  { %v1487_v55 = vpop.f32.mrf.mxu2  ;;  %v3339_v3 = vor.u32 %v3716_v2, %v3336_v6  ;;  %v3350_v6 = vld [vmem:[#allocation8 + $0x180] sm:$0xf] }
 0x10c   :  { %2151 = vmatpush.bf16.msrb.mxu1 %v3251_v13  ;;  %v1689_v61 = vpack.c.bf16 %v1685_v58, %v1685_v58  ;;  %2115 = vmatpush.bf16.msra.mxu2 %v3287_v34  ;;  %v3725_v55 = vld [vmem:[#allocation8 + $0x1a4] sm:$0xf0]  ;;  %v3723_v34 = vld [vmem:[#allocation8 + $0x194] sm:$0xf0] }
 0x10d   :  { %v3367_v58 = vor.u32 %v3725_v55, %v3366_v60 }
 0x10e   :  { %2138 = vmatpush.bf16.msrb.mxu3 %v3187_v11  ;;  %2103 = vmatmul.bf16.vlgmr.msra.gmra.mxu1 %v1689_v61 }
 0x10f   :  { %v1500_v62 = vpop.f32.mrf.mxu0 }
 0x110   :  { %2152 = vmatpush.bf16.msrb.mxu1 %v3243_v21  ;;  %2160 = vmatpush.bf16.msrb.mxu2 %v3347_v1  ;;  %v3304_v21 = vld [vmem:[#allocation8 + $0x128] sm:$0xf0] }
 0x111   :  { %v3307_v23 = vor.u32 %v3708_v20, %v3304_v21  ;;  %v3726_v21 = vld [vmem:[#allocation8 + $0x1b4] sm:$0xf] }
 0x112   :  { %2139 = vmatpush.bf16.msrb.mxu3 %v3179_v57  ;;  %v3406_v57 = vld [vmem:[#allocation8 + $0x1f0] sm:$0xf]  ;;  %v3379_v24 = vor.u32 %v3726_v21, %v3376_v22  ;;  %v3745_v21 = vld [vmem:[#allocation10 + $0x48] sm:$0xff] }
 0x113   :  { %v3407_v19 = vor.u32 %v3735_v17, %v3406_v57  ;;  %v3728_v17 = vld [vmem:[#allocation8 + $0x1c4] sm:$0xf] }
 0x114   :  { %2153 = vmatpush.bf16.msrb.mxu1 %v3235_v37  ;;  %2161 = vmatpush.bf16.msrb.mxu2 %v3339_v3  ;;  %v3288_v37 = vld [vmem:[#allocation8 + $0x108] sm:$0xf0]  ;;  %v3721_v3 = vld [vmem:[#allocation8 + $0x184] sm:$0xf0] }
 0x115   :  { %2121 = vmatpush.bf16.msra.mxu0 %v3407_v19  ;;  %v3291_v42 = vor.u32 %v3704_v36, %v3288_v37  ;;  %v3351_v5 = vor.u32 %v3721_v3, %v3350_v6  ;;  %v3384_v19 = vld [vmem:[#allocation8 + $0x1c8] sm:$0xf0] }
 0x116   :  { %2140 = vmatpush.bf16.msrb.mxu3 %v3171_v33  ;;  %v3387_v20 = vor.u32 %v3728_v17, %v3384_v19  ;;  %v3747_v17 = vld [vmem:[#allocation10 + $0x58] sm:$0xff] }
 0x118   :  { %2154 = vmatpush.bf16.msrb.mxu1 %v3227_v49  ;;  %v1511_v4 = vpop.f32.mrf.mxu1  ;;  %2162 = vmatpush.bf16.msrb.mxu2 %v3331_v9  ;;  %v3374_v49 = vld [vmem:[#allocation8 + $0x1b0] sm:$0xf]  ;;  %v3408_v9 = vld [vmem:[#allocation8 + $0x1f8] sm:$0xf0] }
 0x119   :  { %2122 = vmatpush.bf16.msra.mxu0 %v3399_v25  ;;  %v1512_v40 = vadd.f32 %v1511_v4, %v306_v30  ;;  %v3375_v52 = vor.u32 %v3727_v53, %v3374_v49  ;;  %v3724_v25 = vld [vmem:[#allocation8 + $0x1a4] sm:$0xf]  ;;  %v3360_v30 = vld [vmem:[#allocation8 + $0x198] sm:$0xf0] }
 0x11a   :  { %2141 = vmatpush.bf16.msrb.mxu3 %v3163_v46  ;;  %v3383_v46 = vor.u32 %v3729_v18, %v3382_v44  ;;  %v3371_v28 = vor.u32 %v3724_v25, %v3368_v26 }
 0x11b   :  { %v1537_v8 = vpop.f32.mrf.mxu0 }
 0x11d   :  { %2142 = vmatmul.bf16.vlgmr.msrb.gmra.mxu3 %v4046_v43  ;;  %v3712_v43 = vld [vmem:[#allocation8 + $0x144] sm:$0xf]  ;;  %2123 = vmatpush.bf16.msra.mxu0 %v3391_v35 }
 0x11e   :  { %v3323_v39 = vor.u32 %v3712_v43, %v3320_v10  ;;  %2155 = vmatmul.bf16.vlgmr.msrb.gmra.mxu1 %v1689_v61  ;;  %v3358_v61 = vld [vmem:[#allocation8 + $0x190] sm:$0xf] }
 0x11f   :  { %v3359_v0 = vor.u32 %v3723_v34, %v3358_v61 }
 0x120   :  { %v1513_v11 = vpop.f32.mrf.mxu1  ;;  %v1524_v13 = vpop.f32.mrf.mxu3  ;;  %2163 = vmatpush.bf16.msrb.mxu2 %v3323_v39  ;;  %v3400_v39 = vld [vmem:[#allocation8 + $0x1e8] sm:$0xf0] }
 0x121   :  { %v1525_v45 = vadd.f32 %v1524_v13, %v1512_v40  ;;  %2124 = vmatpush.bf16.msra.mxu0 %v3383_v46  ;;  %v3732_v11 = vld [vmem:[#allocation8 + $0x1e4] sm:$0xf]  ;;  %v3352_v40 = vld [vmem:[#allocation8 + $0x188] sm:$0xf0] }
 0x122   :  { %v3403_v13 = vor.u32 %v3732_v11, %v3400_v39  ;;  %v3750_v11 = vld [vmem:[#allocation10 + $0x70] sm:$0xff]  ;;  %v3739_v39 = vld [vmem:[#allocation10 + $0x18] sm:$0xff] }
 0x123   :  { %v1550_v12 = vpop.f32.mrf.mxu2  ;;  %v1539_v15 = vpop.f32.mrf.mxu0  ;;  %v1538_v50 = vadd.f32 %v1537_v8, %v1525_v45  ;;  %v3734_v8 = vld [vmem:[#allocation8 + $0x1f4] sm:$0xf] }
 0x124   :  { %2164 = vmatpush.bf16.msrb.mxu2 %v3315_v16  ;;  %v3411_v43 = vor.u32 %v3734_v8, %v3408_v9  ;;  %v3730_v15 = vld [vmem:[#allocation8 + $0x1d4] sm:$0xf]  ;;  %v3392_v16 = vld [vmem:[#allocation8 + $0x1d8] sm:$0xf0]  ;;  %v3741_v9 = vld [vmem:[#allocation10 + $0x28] sm:$0xff] }
 0x125   :  { %2125 = vmatpush.bf16.msra.mxu0 %v3375_v52  ;;  %v1551_v56 = vadd.f32 %v1550_v12, %v1538_v50  ;;  %v3395_v57 = vor.u32 %v3730_v15, %v3392_v16  ;;  %v3742_v8 = vld [vmem:[#allocation10 + $0x30] sm:$0xff]  ;;  %v3736_v16 = vld [vmem:[#allocation10] sm:$0xff] }
 0x128   :  { %v1526_v33 = vpop.f32.mrf.mxu3  ;;  %2165 = vmatpush.bf16.msrb.mxu2 %v3307_v23 }
 0x129   :  { %2126 = vmatpush.bf16.msra.mxu0 %v3367_v58 }
 0x12b   :  { %v1552_v32 = vpop.f32.mrf.mxu2  ;;  %v1589_v38 = vpop.f32.mrf.mxu0 }
 0x12c   :  { %2166 = vmatpush.bf16.msrb.mxu2 %v3299_v48  ;;  %v3363_v32 = vor.u32 %v3722_v29, %v3360_v30 }
 0x12d   :  { %2127 = vmatpush.bf16.msra.mxu0 %v3359_v0 }
 0x130   :  { %2167 = vmatpush.bf16.msrb.mxu2 %v3291_v42 }
 0x131   :  { %2128 = vmatpush.bf16.msra.mxu0 %v3351_v5 }
 0x133   :  { %v1591_v47 = vpop.f32.mrf.mxu0 }
 0x135   :  { %2173 = vmatpush.bf16.msrb.mxu0 %v3411_v43  ;;  %v3740_v43 = vld [vmem:[#allocation10 + $0x20] sm:$0xff] }
 0x138   :  { %v1563_v51 = vpop.f32.mrf.mxu1 }
 0x139   :  { %v1564_v31 = vadd.f32 %v1563_v51, %v1551_v56  ;;  %2174 = vmatpush.bf16.msrb.mxu0 %v3403_v13  ;;  %v3738_v13 = vld [vmem:[#allocation10 + $0x10] sm:$0xff] }
 0x13d   :  { %2175 = vmatpush.bf16.msrb.mxu0 %v3395_v57  ;;  %v3748_v57 = vld [vmem:[#allocation10 + $0x60] sm:$0xff] }
 0x13f   :  { %v1615_v2 = vpop.f32.mrf.mxu0 }
 0x140   :  { %v1576_v59 = vpop.f32.mrf.mxu3  ;;  %v1565_v63 = vpop.f32.mrf.mxu1 }
 0x141   :  { %v1577_v62 = vadd.f32 %v1576_v59, %v1564_v31  ;;  %2176 = vmatpush.bf16.msrb.mxu0 %v3387_v20  ;;  %v1756_v31 = vld [vmem:[%s4065_s4] sm:$0x3]  ;;  %v3746_v20 = vld [vmem:[#allocation10 + $0x50] sm:$0xff] }
 0x142   :  { %v1758_v59 = vperm.slane %v1756_v31, 0 }
 0x143   :  { %v1602_v1 = vpop.f32.mrf.mxu2  ;;  %v1590_v4 = vadd.f32 %v1589_v38, %v1577_v62  ;;  %v3720_v38 = vld [vmem:[#allocation8 + $0x184] sm:$0xf] }
 0x144   :  { %v1603_v48 = vadd.f32 %v1602_v1, %v307_v27  ;;  %v3355_v44 = vor.u32 %v3720_v38, %v3352_v40  ;;  %v1759_v1 = vperm.slane %v1756_v31, 1  ;;  %v3764_v38 = vld [vmem:[%s4067_s6] ss:$0 sm:$0xff] }
 0x145   :  { %v1686_v7 = vmax.f32 %v1590_v4, 0.0  ;;  %2177 = vmatpush.bf16.msrb.mxu0 %v3379_v24 }
 0x146   :  { %v1616_v42 = vadd.f32 %v1615_v2, %v1603_v48 }
 0x147   :  { %v1690_v10 = vpack.c.bf16 %v1686_v7, %v1686_v7  ;;  %v1617_v41 = vpop.f32.mrf.mxu0  ;;  %v3743_v7 = vld [vmem:[#allocation10 + $0x38] sm:$0xff] }
 0x148   :  { %v1578_v12 = vpop.f32.mrf.mxu3  ;;  %2322 = vmatpush.bf16.msra.mxu3 %v3743_v7  ;;  %v3749_v41 = vld [vmem:[#allocation10 + $0x68] sm:$0xff] }
 0x149   :  { %2116 = vmatmul.bf16.vlgmr.msra.gmra.mxu2 %v1690_v10  ;;  %2178 = vmatpush.bf16.msrb.mxu0 %v3371_v28 }
 0x14b   :  { %v1604_v14 = vpop.f32.mrf.mxu2 }
 0x14c   :  { %2323 = vmatpush.bf16.msra.mxu3 %v3742_v8  ;;  %v3737_v14 = vld [vmem:[#allocation10 + $0x8] sm:$0xff] }
 0x14d   :  { %2179 = vmatpush.bf16.msrb.mxu0 %v3363_v32 }
 0x150   :  { %2324 = vmatpush.bf16.msra.mxu3 %v3741_v9 }
 0x151   :  { %2180 = vmatpush.bf16.msrb.mxu0 %v3355_v44 }
 0x154   :  { %2325 = vmatpush.bf16.msra.mxu3 %v3740_v43 }
 0x158   :  { %v1628_v23 = vpop.f32.mrf.mxu1  ;;  %2326 = vmatpush.bf16.msra.mxu3 %v3739_v39 }
 0x159   :  { %2168 = vmatmul.bf16.vlgmr.msrb.gmra.mxu2 %v1690_v10  ;;  %v1629_v18 = vadd.f32 %v1628_v23, %v1616_v42  ;;  %v3751_v10 = vld [vmem:[#allocation10 + $0x78] sm:$0xff]  ;;  %v3744_v23 = vld [vmem:[#allocation10 + $0x40] sm:$0xff] }
 0x15a   :  { %2335 = vmatpush.bf16.msra.mxu1 %v3751_v10 }
 0x15c   :  { %2327 = vmatpush.bf16.msra.mxu3 %v3738_v13 }
 0x15e   :  { %2336 = vmatpush.bf16.msra.mxu1 %v3750_v11 }
 0x15f   :  { %v1667_v37 = vpop.f32.mrf.mxu0 }
 0x160   :  { %v1641_v33 = vpop.f32.mrf.mxu3  ;;  %v1630_v35 = vpop.f32.mrf.mxu1  ;;  %2328 = vmatpush.bf16.msra.mxu3 %v3737_v14 }
 0x161   :  { %v1642_v46 = vadd.f32 %v1641_v33, %v1629_v18 }
 0x162   :  { %2337 = vmatpush.bf16.msra.mxu1 %v3749_v41 }
 0x163   :  { %v1654_v36 = vpop.f32.mrf.mxu2 }
 0x164   :  { %v1655_v49 = vadd.f32 %v1654_v36, %v1642_v46  ;;  %2329 = vmatpush.bf16.msra.mxu3 %v3736_v16 }
 0x166   :  { %v1668_v53 = vadd.f32 %v1667_v37, %v1655_v49  ;;  %2338 = vmatpush.bf16.msra.mxu1 %v3748_v57 }
 0x167   :  { %v1669_v47 = vpop.f32.mrf.mxu0 }
 0x168   :  { %v1643_v45 = vpop.f32.mrf.mxu3 }
 0x16a   :  { %2339 = vmatpush.bf16.msra.mxu1 %v3747_v17 }
 0x16b   :  { %v1656_v54 = vpop.f32.mrf.mxu2 }
 0x16e   :  { %2340 = vmatpush.bf16.msra.mxu1 %v3746_v20 }
 0x172   :  { %2341 = vmatpush.bf16.msra.mxu1 %v3745_v21 }
 0x173   :  { %v1680_v50 = vpop.f32.mrf.mxu2 }
 0x174   :  { %v1681_v51 = vadd.f32 %v1680_v50, %v1668_v53 }
 0x176   :  { %v1687_v52 = vmax.f32 %v1681_v51, 0.0  ;;  %2342 = vmatpush.bf16.msra.mxu1 %v3744_v23 }
 0x178   :  { %v1691_v60 = vpack.c.bf16 %v1687_v52, %v1687_v52 }
 0x17a   :  { %2129 = vmatmul.bf16.vlgmr.msra.gmra.mxu0 %v1691_v60 }
 0x17b   :  { %v1682_v55 = vpop.f32.mrf.mxu2 }
 0x180   :  { %v2091_v56 = vpop.f32.mrf.mxu3 }
 0x181   :  { %v2092_v61 = vadd.f32 %v2091_v56, %v1758_v59 }
 0x188   :  { %v2093_v58 = vpop.f32.mrf.mxu3 }
 0x18a   :  { %2181 = vmatmul.bf16.vlgmr.msrb.gmra.mxu0 %v1691_v60 }
 0x18b   :  { %v2104_v34 = vpop.f32.mrf.mxu1 }
 0x18c   :  { %v2105_v62 = vadd.f32 %v2104_v34, %v2092_v61 }
 0x193   :  { %v2106_v0 = vpop.f32.mrf.mxu1 }
 0x19b   :  { %v2156_v3 = vpop.f32.mrf.mxu1 }
 0x1a0   :  { %v2143_v63 = vpop.f32.mrf.mxu3 }
 0x1a1   :  { %v2144_v6 = vadd.f32 %v2143_v63, %v1759_v1 }
 0x1a3   :  { %v2157_v4 = vadd.f32 %v2156_v3, %v2144_v6  ;;  %v2158_v5 = vpop.f32.mrf.mxu1 }
 0x1a8   :  { %v2145_v2 = vpop.f32.mrf.mxu3 }
 0x1cc   :  { %v2117_v12 = vpop.f32.mrf.mxu2 }
 0x1cd   :  { %v2118_v24 = vadd.f32 %v2117_v12, %v2105_v62 }
 0x1d4   :  { %v2119_v15 = vpop.f32.mrf.mxu2 }
 0x1dc   :  { %v2169_v19 = vpop.f32.mrf.mxu2 }
 0x1dd   :  { %v2170_v30 = vadd.f32 %v2169_v19, %v2157_v4 }
 0x1e4   :  { %v2171_v22 = vpop.f32.mrf.mxu2 }
 0x1f7   :  { %v2130_v25 = vpop.f32.mrf.mxu0 }
 0x1f8   :  { %v2131_v26 = vadd.f32 %v2130_v25, %v2118_v24 }
 0x1fa   :  { %v2186_v27 = vmax.f32 %v2131_v26, 0.0 }
 0x1fc   :  { %v2188_v28 = vpack.c.bf16 %v2186_v27, %v2186_v27 }
 0x1fe   :  { %2330 = vmatmul.bf16.vlgmr.msra.gmra.mxu3 %v2188_v28 }
 0x1ff   :  { %v2132_v29 = vpop.f32.mrf.mxu0 }
 0x207   :  { %v2182_v32 = vpop.f32.mrf.mxu0 }
 0x208   :  { %v2183_v33 = vadd.f32 %v2182_v32, %v2170_v30 }
 0x20a   :  { %v2187_v48 = vmax.f32 %v2183_v33, 0.0 }
 0x20c   :  { %v2189_v35 = vpack.c.bf16 %v2187_v48, %v2187_v48 }
 0x20e   :  { %2343 = vmatmul.bf16.vlgmr.msra.gmra.mxu1 %v2189_v35 }
 0x20f   :  { %v2184_v36 = vpop.f32.mrf.mxu0 }
 0x281   :  { %v2331_v37 = vpop.f32.mrf.mxu3 }
 0x282   :  { %v2332_v42 = vadd.f32 %v3764_v38, %v2331_v37 }
 0x289   :  { %v2333_v40 = vpop.f32.mrf.mxu3 }
 0x28b   :  { %v2344_v44 = vpop.f32.mrf.mxu1 }
 0x28c   :  { %v2345_v18 = vadd.f32 %v2344_v44, %v2332_v42 }
 0x28e   :  { %2348 = vst [vmem:[#allocation11] sm:$0xff] %v2345_v18 }
 0x28f   :  { %2359 = dma.vmem_to_hbm [thread:$0]  %s2355_s8, 128, %s2357_s11, [#allocation4]  }
 0x293   :  { %v2346_v45 = vpop.f32.mrf.mxu1 }
 0x294   :  { %3915 = dma.done.wait [#allocation4], 128  }
 0x295   :  { %3916 = vsyncadd [#allocation4], 4294967168 }
 0x296   :  { %2364 = vsyncpa [#allocation3], 1 }
 0x297   :  { %2365 = vsyncpa [#allocation6], 1 }
 0x298   :  { %2366 = vsyncpa [#allocation9], 1 }
 0x299   :  { %2367 = vsyncpa [#allocation4], 1 }

</bundles_post_ra>
